<compile_context>
chip_gen: v7x
topology: tpu7x:2x2x1
jax: 0.10.0
libtpu: 0.0.40
codegen_flags: <defaults>
</compile_context>

<pallas_src>
import functools

import jax
import jax.numpy as jnp
from jax.experimental import pallas as pl
from jax.experimental.pallas import tpu as pltpu


def _gru_linear_kernel(x_ref, wih_ref, whh_ref, bias_ref, wo_ref, bo_ref,
                       y_ref, gir_ref, giz_ref, gin_ref, hs_ref,
                       *, seq_len, batch_p, hidden):
    T, Bp, H = seq_len, batch_p, hidden

    # ---- Entry (runs once): input projection for ALL timesteps -------------
    # No serial dependence -> one batched matmul per gate over (T*Bp, 2F).
    x_all = x_ref[...]                                            # (T*Bp, 2F)
    gir_ref[...] = (jnp.dot(x_all, wih_ref[0], preferred_element_type=jnp.float32)
                    + bias_ref[0:1, :])                           # b_ir + b_hr folded
    giz_ref[...] = (jnp.dot(x_all, wih_ref[1], preferred_element_type=jnp.float32)
                    + bias_ref[1:2, :])                           # b_iz + b_hz folded
    gin_ref[...] = (jnp.dot(x_all, wih_ref[2], preferred_element_type=jnp.float32)
                    + bias_ref[2:3, :])                           # b_in folded

    whh_r = whh_ref[0]                                            # (H, H)
    whh_z = whh_ref[1]
    whh_n = whh_ref[2]
    b_hn = bias_ref[3:4, :]                                       # stays inside r*(.)

    # ---- Serial recurrence: only h @ W_hh + pointwise gates on the chain ---
    def step(t, h):
        row = pl.multiple_of(t * Bp, Bp)
        gh_r = jnp.dot(h, whh_r, preferred_element_type=jnp.float32)
        gh_z = jnp.dot(h, whh_z, preferred_element_type=jnp.float32)
        gh_n = jnp.dot(h, whh_n, preferred_element_type=jnp.float32) + b_hn
        r = jax.nn.sigmoid(gir_ref[pl.ds(row, Bp), :] + gh_r)
        z = jax.nn.sigmoid(giz_ref[pl.ds(row, Bp), :] + gh_z)
        n = jnp.tanh(gin_ref[pl.ds(row, Bp), :] + r * gh_n)
        h_new = (1.0 - z) * n + z * h
        hs_ref[pl.ds(row, Bp), :] = h_new
        return h_new

    h0 = jnp.zeros((Bp, H), jnp.float32)
    jax.lax.fori_loop(0, T, step, h0, unroll=True)

    # ---- Tail (runs once): batched output Linear, single slab store --------
    y = (jnp.dot(hs_ref[...], wo_ref[...], preferred_element_type=jnp.float32)
         + bo_ref[...])                                           # (T*Bp, O)
    y_ref[...] = y.astype(y_ref.dtype)


@functools.partial(jax.jit, static_argnums=(2,))
def gru_linear_forward(x, params, hidden_units):
    """x: (2, B, T, F) float32 -> y: (B, T, O) float32 (matches the PyTorch Model)."""
    two, B, T, F = x.shape
    assert two == 2
    H = hidden_units
    w_ih, w_hh, b_ih, b_hh, w_lin, b_lin = params
    O = w_lin.shape[0]

    Bp = ((B + 7) // 8) * 8            # pad batch to a full sublane tile (8)

    # PyTorch glue (transpose/transpose/reshape) fused into one transpose,
    # then time-major, batch-padded and flattened to (T*Bp, 2F).
    x_tbf = jnp.transpose(x, (2, 1, 0, 3)).reshape(T, B, 2 * F)   # (T, B, 2F)
    x_tbf = jnp.pad(x_tbf, ((0, 0), (0, Bp - B), (0, 0)))         # (T, Bp, 2F)
    x_flat = x_tbf.reshape(T * Bp, 2 * F)

    # Per-gate weights (PyTorch gate order [r, z, n]), transposed for x @ W.
    wih = jnp.transpose(w_ih.reshape(3, H, 2 * F), (0, 2, 1))     # (3, 2F, H)
    whh = jnp.transpose(w_hh.reshape(3, H, H), (0, 2, 1))         # (3, H, H)

    # Fold biases at trace time: r/z input+hidden biases merge; n keeps b_hh_n.
    b_ih_g = b_ih.reshape(3, H)
    b_hh_g = b_hh.reshape(3, H)
    bias = jnp.stack([b_ih_g[0] + b_hh_g[0],
                      b_ih_g[1] + b_hh_g[1],
                      b_ih_g[2],
                      b_hh_g[2]], axis=0)                         # (4, H)

    wo = jnp.transpose(w_lin)                                     # (H, O)
    bo = b_lin.reshape(1, O)

    kernel = functools.partial(_gru_linear_kernel,
                               seq_len=T, batch_p=Bp, hidden=H)

    y_flat = pl.pallas_call(
        kernel,
        out_shape=jax.ShapeDtypeStruct((T * Bp, O), jnp.float32),
        grid_spec=pltpu.PrefetchScalarGridSpec(
            num_scalar_prefetch=0,
            grid=(1,),                                            # whole sequence in one program
            in_specs=[
                pl.BlockSpec((T * Bp, 2 * F), lambda i: (0, 0)),  # x (all timesteps)
                pl.BlockSpec((3, 2 * F, H), lambda i: (0, 0, 0)), # W_ih^T per gate
                pl.BlockSpec((3, H, H), lambda i: (0, 0, 0)),     # W_hh^T per gate
                pl.BlockSpec((4, H), lambda i: (0, 0)),           # folded biases
                pl.BlockSpec((H, O), lambda i: (0, 0)),           # W_lin^T
                pl.BlockSpec((1, O), lambda i: (0, 0)),           # b_lin
            ],
            out_specs=pl.BlockSpec((T * Bp, O), lambda i: (0, 0)),
            scratch_shapes=[
                pltpu.VMEM((T * Bp, H), jnp.float32),             # gi_r (all t)
                pltpu.VMEM((T * Bp, H), jnp.float32),             # gi_z (all t)
                pltpu.VMEM((T * Bp, H), jnp.float32),             # gi_n (all t)
                pltpu.VMEM((T * Bp, H), jnp.float32),             # h history
            ],
        ),
        compiler_params=pltpu.CompilerParams(
            dimension_semantics=("arbitrary",),
        ),
    )(x_flat, wih, whh, bias, wo, bo)

    y = y_flat.reshape(T, Bp, O)[:, :B, :]                        # drop batch padding
    return jnp.transpose(y, (1, 0, 2))                            # (B, T, O)


def _reference_forward(x, params, hidden_units):
    """Pure-JAX reference of the same forward, for verification."""
    two, B, T, F = x.shape
    H = hidden_units
    w_ih, w_hh, b_ih, b_hh, w_lin, b_lin = params
    x_btf = jnp.transpose(x, (1, 2, 0, 3)).reshape(B, T, 2 * F)

    def step(h, x_t):
        gi = x_t @ w_ih.T + b_ih
        gh = h @ w_hh.T + b_hh
        i_r, i_z, i_n = gi[:, :H], gi[:, H:2 * H], gi[:, 2 * H:]
        h_r, h_z, h_n = gh[:, :H], gh[:, H:2 * H], gh[:, 2 * H:]
        r = jax.nn.sigmoid(i_r + h_r)
        z = jax.nn.sigmoid(i_z + h_z)
        n = jnp.tanh(i_n + r * h_n)
        h_new = (1.0 - z) * n + z * h
        return h_new, h_new

    h0 = jnp.zeros((B, H), jnp.float32)
    _, hs = jax.lax.scan(step, h0, jnp.transpose(x_btf, (1, 0, 2)))  # (T, B, H)
    y = hs @ w_lin.T + b_lin                                          # (T, B, O)
    return jnp.transpose(y, (1, 0, 2))


def init_params(key, in_feat, hidden_units, out_dim):
    """Deterministic init mimicking PyTorch's U(-1/sqrt(H), 1/sqrt(H))."""
    H = hidden_units
    bound = 1.0 / jnp.sqrt(jnp.float32(H))
    ks = jax.random.split(key, 6)
    w_ih = jax.random.uniform(ks[0], (3 * H, 2 * in_feat), jnp.float32, -bound, bound)
    w_hh = jax.random.uniform(ks[1], (3 * H, H), jnp.float32, -bound, bound)
    b_ih = jax.random.uniform(ks[2], (3 * H,), jnp.float32, -bound, bound)
    b_hh = jax.random.uniform(ks[3], (3 * H,), jnp.float32, -bound, bound)
    w_lin = jax.random.uniform(ks[4], (out_dim, H), jnp.float32, -bound, bound)
    b_lin = jax.random.uniform(ks[5], (out_dim,), jnp.float32, -bound, bound)
    return (w_ih, w_hh, b_ih, b_hh, w_lin, b_lin)


if __name__ == "__main__":
    # Small shapes consistent with the module:
    #   input_shape = (F,) = (4,), output_shape = (O,) = (2,), hidden_units = 16
    #   x: (2, batch, seq, F) = (2, 2, 8, 4)
    F, O, H = 4, 2, 16
    B, T = 2, 8

    key = jax.random.PRNGKey(0)
    kx, kp = jax.random.split(key)
    x = jax.random.normal(kx, (2, B, T, F), jnp.float32)
    params = init_params(kp, F, H, O)

    y = jax.block_until_ready(gru_linear_forward(x, params, H))
    y_ref = jax.block_until_ready(_reference_forward(x, params, H))

    assert y.shape == (B, T, O)
    assert jnp.allclose(y, y_ref, atol=1e-5, rtol=1e-5), "mismatch vs reference"

    print("KERNEL_OK")
</pallas_src>

<mosaic_0001>
module attributes {stable_mosaic.version = 11 : i64} {
  func.func @_gru_linear_kernel(%arg0: i32, %arg1: memref<64x8xf32, #tpu.memory_space<vmem>>, %arg2: memref<3x8x16xf32, #tpu.memory_space<vmem>>, %arg3: memref<3x16x16xf32, #tpu.memory_space<vmem>>, %arg4: memref<4x16xf32, #tpu.memory_space<vmem>>, %arg5: memref<16x2xf32, #tpu.memory_space<vmem>>, %arg6: memref<1x2xf32, #tpu.memory_space<vmem>>, %arg7: memref<64x2xf32, #tpu.memory_space<vmem>>, %arg8: memref<64x16xf32, #tpu.memory_space<vmem>>, %arg9: memref<64x16xf32, #tpu.memory_space<vmem>>, %arg10: memref<64x16xf32, #tpu.memory_space<vmem>>, %arg11: memref<64x16xf32, #tpu.memory_space<vmem>>) attributes {dimension_semantics = [#tpu.dimension_semantics<arbitrary>], iteration_bounds = array<i64: 1>, scalar_prefetch = 0 : i64, scratch_operands = 4 : i64, tpu.core_type = #tpu.core_type<tc>, window_params = [{pipeline_mode = #tpu.pipeline_mode<synchronous>, transform_indices = @transform_0, window_bounds = array<i64: 64, 8>}, {pipeline_mode = #tpu.pipeline_mode<synchronous>, transform_indices = @transform_1, window_bounds = array<i64: 3, 8, 16>}, {pipeline_mode = #tpu.pipeline_mode<synchronous>, transform_indices = @transform_2, window_bounds = array<i64: 3, 16, 16>}, {pipeline_mode = #tpu.pipeline_mode<synchronous>, transform_indices = @transform_3, window_bounds = array<i64: 4, 16>}, {pipeline_mode = #tpu.pipeline_mode<synchronous>, transform_indices = @transform_4, window_bounds = array<i64: 16, 2>}, {pipeline_mode = #tpu.pipeline_mode<synchronous>, transform_indices = @transform_5, window_bounds = array<i64: 1, 2>}, {pipeline_mode = #tpu.pipeline_mode<synchronous>, transform_indices = @transform_6, window_bounds = array<i64: 64, 2>}]} {
    %c0 = arith.constant 0 : index
    %c0_0 = arith.constant 0 : index
    %0 = vector.load %arg1[%c0, %c0_0] : memref<64x8xf32, #tpu.memory_space<vmem>>, vector<64x8xf32>
    %c0_1 = arith.constant 0 : index
    %c0_2 = arith.constant 0 : index
    %c0_3 = arith.constant 0 : index
    %1 = vector.load %arg2[%c0_1, %c0_2, %c0_3] : memref<3x8x16xf32, #tpu.memory_space<vmem>>, vector<1x8x16xf32>
    %2 = vector.shape_cast %1 : vector<1x8x16xf32> to vector<8x16xf32>
    %cst = arith.constant dense<0.000000e+00> : vector<64x16xf32>
    %3 = tpu.matmul %0, %2, %cst {dimension_numbers = #tpu.dot_dimension_numbers<[1], [0], [0], [1], [0, 0, 1, 1], [], []>} : vector<64x8xf32>, vector<8x16xf32>, vector<64x16xf32> -> vector<64x16xf32>
    %c0_4 = arith.constant 0 : index
    %c0_5 = arith.constant 0 : index
    %4 = vector.load %arg4[%c0_4, %c0_5] : memref<4x16xf32, #tpu.memory_space<vmem>>, vector<1x16xf32>
    %5 = vector.broadcast %4 : vector<1x16xf32> to vector<64x16xf32>
    %6 = arith.addf %3, %5 : vector<64x16xf32>
    %c0_6 = arith.constant 0 : index
    %c0_7 = arith.constant 0 : index
    %7 = vector.load %arg8[%c0_6, %c0_7] : memref<64x16xf32, #tpu.memory_space<vmem>>, vector<64x16xf32>
    tpu.vector_store %arg8[%c0_6, %c0_7], %6 {strides = array<i32>} : memref<64x16xf32, #tpu.memory_space<vmem>>, vector<64x16xf32>,
    %c1 = arith.constant 1 : index
    %c0_8 = arith.constant 0 : index
    %c0_9 = arith.constant 0 : index
    %8 = vector.load %arg2[%c1, %c0_8, %c0_9] : memref<3x8x16xf32, #tpu.memory_space<vmem>>, vector<1x8x16xf32>
    %9 = vector.shape_cast %8 : vector<1x8x16xf32> to vector<8x16xf32>
    %cst_10 = arith.constant dense<0.000000e+00> : vector<64x16xf32>
    %10 = tpu.matmul %0, %9, %cst_10 {dimension_numbers = #tpu.dot_dimension_numbers<[1], [0], [0], [1], [0, 0, 1, 1], [], []>} : vector<64x8xf32>, vector<8x16xf32>, vector<64x16xf32> -> vector<64x16xf32>
    %c1_11 = arith.constant 1 : index
    %c0_12 = arith.constant 0 : index
    %11 = vector.load %arg4[%c1_11, %c0_12] : memref<4x16xf32, #tpu.memory_space<vmem>>, vector<1x16xf32>
    %12 = vector.broadcast %11 : vector<1x16xf32> to vector<64x16xf32>
    %13 = arith.addf %10, %12 : vector<64x16xf32>
    %c0_13 = arith.constant 0 : index
    %c0_14 = arith.constant 0 : index
    %14 = vector.load %arg9[%c0_13, %c0_14] : memref<64x16xf32, #tpu.memory_space<vmem>>, vector<64x16xf32>
    tpu.vector_store %arg9[%c0_13, %c0_14], %13 {strides = array<i32>} : memref<64x16xf32, #tpu.memory_space<vmem>>, vector<64x16xf32>,
    %c2 = arith.constant 2 : index
    %c0_15 = arith.constant 0 : index
    %c0_16 = arith.constant 0 : index
    %15 = vector.load %arg2[%c2, %c0_15, %c0_16] : memref<3x8x16xf32, #tpu.memory_space<vmem>>, vector<1x8x16xf32>
    %16 = vector.shape_cast %15 : vector<1x8x16xf32> to vector<8x16xf32>
    %cst_17 = arith.constant dense<0.000000e+00> : vector<64x16xf32>
    %17 = tpu.matmul %0, %16, %cst_17 {dimension_numbers = #tpu.dot_dimension_numbers<[1], [0], [0], [1], [0, 0, 1, 1], [], []>} : vector<64x8xf32>, vector<8x16xf32>, vector<64x16xf32> -> vector<64x16xf32>
    %c2_18 = arith.constant 2 : index
    %c0_19 = arith.constant 0 : index
    %18 = vector.load %arg4[%c2_18, %c0_19] : memref<4x16xf32, #tpu.memory_space<vmem>>, vector<1x16xf32>
    %19 = vector.broadcast %18 : vector<1x16xf32> to vector<64x16xf32>
    %20 = arith.addf %17, %19 : vector<64x16xf32>
    %c0_20 = arith.constant 0 : index
    %c0_21 = arith.constant 0 : index
    %21 = vector.load %arg10[%c0_20, %c0_21] : memref<64x16xf32, #tpu.memory_space<vmem>>, vector<64x16xf32>
    tpu.vector_store %arg10[%c0_20, %c0_21], %20 {strides = array<i32>} : memref<64x16xf32, #tpu.memory_space<vmem>>, vector<64x16xf32>,
    %c0_22 = arith.constant 0 : index
    %c0_23 = arith.constant 0 : index
    %c0_24 = arith.constant 0 : index
    %22 = vector.load %arg3[%c0_22, %c0_23, %c0_24] : memref<3x16x16xf32, #tpu.memory_space<vmem>>, vector<1x16x16xf32>
    %23 = vector.shape_cast %22 : vector<1x16x16xf32> to vector<16x16xf32>
    %c1_25 = arith.constant 1 : index
    %c0_26 = arith.constant 0 : index
    %c0_27 = arith.constant 0 : index
    %24 = vector.load %arg3[%c1_25, %c0_26, %c0_27] : memref<3x16x16xf32, #tpu.memory_space<vmem>>, vector<1x16x16xf32>
    %25 = vector.shape_cast %24 : vector<1x16x16xf32> to vector<16x16xf32>
    %c2_28 = arith.constant 2 : index
    %c0_29 = arith.constant 0 : index
    %c0_30 = arith.constant 0 : index
    %26 = vector.load %arg3[%c2_28, %c0_29, %c0_30] : memref<3x16x16xf32, #tpu.memory_space<vmem>>, vector<1x16x16xf32>
    %27 = vector.shape_cast %26 : vector<1x16x16xf32> to vector<16x16xf32>
    %c3 = arith.constant 3 : index
    %c0_31 = arith.constant 0 : index
    %28 = vector.load %arg4[%c3, %c0_31] : memref<4x16xf32, #tpu.memory_space<vmem>>, vector<1x16xf32>
    %cst_32 = arith.constant 0.000000e+00 : f32
    %29 = vector.broadcast %cst_32 : f32 to vector<8x16xf32>
    %c0_i32 = arith.constant 0 : i32
    %c8_i32 = arith.constant 8 : i32
    %30 = arith.muli %c0_i32, %c8_i32 : i32
    %31 = tpu.assume_multiple %30, 8 : i32
    %cst_33 = arith.constant dense<0.000000e+00> : vector<8x16xf32>
    %32 = tpu.matmul %29, %23, %cst_33 {dimension_numbers = #tpu.dot_dimension_numbers<[1], [0], [0], [1], [0, 0, 1, 1], [], []>} : vector<8x16xf32>, vector<16x16xf32>, vector<8x16xf32> -> vector<8x16xf32>
    %cst_34 = arith.constant dense<0.000000e+00> : vector<8x16xf32>
    %33 = tpu.matmul %29, %25, %cst_34 {dimension_numbers = #tpu.dot_dimension_numbers<[1], [0], [0], [1], [0, 0, 1, 1], [], []>} : vector<8x16xf32>, vector<16x16xf32>, vector<8x16xf32> -> vector<8x16xf32>
    %cst_35 = arith.constant dense<0.000000e+00> : vector<8x16xf32>
    %34 = tpu.matmul %29, %27, %cst_35 {dimension_numbers = #tpu.dot_dimension_numbers<[1], [0], [0], [1], [0, 0, 1, 1], [], []>} : vector<8x16xf32>, vector<16x16xf32>, vector<8x16xf32> -> vector<8x16xf32>
    %35 = vector.broadcast %28 : vector<1x16xf32> to vector<8x16xf32>
    %36 = arith.addf %34, %35 : vector<8x16xf32>
    %37 = arith.index_cast %31 : i32 to index
    %c0_36 = arith.constant 0 : index
    %38 = vector.load %arg8[%37, %c0_36] : memref<64x16xf32, #tpu.memory_space<vmem>>, vector<8x16xf32>
    %39 = arith.addf %38, %32 : vector<8x16xf32>
    %40 = arith.negf %39 : vector<8x16xf32>
    %41 = math.exp %40 : vector<8x16xf32>
    %cst_37 = arith.constant 1.000000e+00 : f32
    %42 = vector.broadcast %cst_37 : f32 to vector<8x16xf32>
    %43 = arith.addf %42, %41 : vector<8x16xf32>
    %44 = arith.divf %42, %43 : vector<8x16xf32>
    %45 = arith.index_cast %31 : i32 to index
    %c0_38 = arith.constant 0 : index
    %46 = vector.load %arg9[%45, %c0_38] : memref<64x16xf32, #tpu.memory_space<vmem>>, vector<8x16xf32>
    %47 = arith.addf %46, %33 : vector<8x16xf32>
    %48 = arith.negf %47 : vector<8x16xf32>
    %49 = math.exp %48 : vector<8x16xf32>
    %cst_39 = arith.constant 1.000000e+00 : f32
    %50 = vector.broadcast %cst_39 : f32 to vector<8x16xf32>
    %51 = arith.addf %50, %49 : vector<8x16xf32>
    %52 = arith.divf %50, %51 : vector<8x16xf32>
    %53 = arith.index_cast %31 : i32 to index
    %c0_40 = arith.constant 0 : index
    %54 = vector.load %arg10[%53, %c0_40] : memref<64x16xf32, #tpu.memory_space<vmem>>, vector<8x16xf32>
    %55 = arith.mulf %44, %36 : vector<8x16xf32>
    %56 = arith.addf %54, %55 : vector<8x16xf32>
    %57 = math.tanh %56 : vector<8x16xf32>
    %cst_41 = arith.constant 1.000000e+00 : f32
    %58 = vector.broadcast %cst_41 : f32 to vector<8x16xf32>
    %59 = arith.subf %58, %52 : vector<8x16xf32>
    %60 = arith.mulf %59, %57 : vector<8x16xf32>
    %61 = arith.mulf %52, %29 : vector<8x16xf32>
    %62 = arith.addf %60, %61 : vector<8x16xf32>
    %63 = arith.index_cast %31 : i32 to index
    %c0_42 = arith.constant 0 : index
    %64 = vector.load %arg11[%63, %c0_42] : memref<64x16xf32, #tpu.memory_space<vmem>>, vector<8x16xf32>
    tpu.vector_store %arg11[%63, %c0_42], %62 {strides = array<i32>} : memref<64x16xf32, #tpu.memory_space<vmem>>, vector<8x16xf32>,
    %c1_i32 = arith.constant 1 : i32
    %c8_i32_43 = arith.constant 8 : i32
    %65 = arith.muli %c1_i32, %c8_i32_43 : i32
    %66 = tpu.assume_multiple %65, 8 : i32
    %cst_44 = arith.constant dense<0.000000e+00> : vector<8x16xf32>
    %67 = tpu.matmul %62, %23, %cst_44 {dimension_numbers = #tpu.dot_dimension_numbers<[1], [0], [0], [1], [0, 0, 1, 1], [], []>} : vector<8x16xf32>, vector<16x16xf32>, vector<8x16xf32> -> vector<8x16xf32>
    %cst_45 = arith.constant dense<0.000000e+00> : vector<8x16xf32>
    %68 = tpu.matmul %62, %25, %cst_45 {dimension_numbers = #tpu.dot_dimension_numbers<[1], [0], [0], [1], [0, 0, 1, 1], [], []>} : vector<8x16xf32>, vector<16x16xf32>, vector<8x16xf32> -> vector<8x16xf32>
    %cst_46 = arith.constant dense<0.000000e+00> : vector<8x16xf32>
    %69 = tpu.matmul %62, %27, %cst_46 {dimension_numbers = #tpu.dot_dimension_numbers<[1], [0], [0], [1], [0, 0, 1, 1], [], []>} : vector<8x16xf32>, vector<16x16xf32>, vector<8x16xf32> -> vector<8x16xf32>
    %70 = vector.broadcast %28 : vector<1x16xf32> to vector<8x16xf32>
    %71 = arith.addf %69, %70 : vector<8x16xf32>
    %72 = arith.index_cast %66 : i32 to index
    %c0_47 = arith.constant 0 : index
    %73 = vector.load %arg8[%72, %c0_47] : memref<64x16xf32, #tpu.memory_space<vmem>>, vector<8x16xf32>
    %74 = arith.addf %73, %67 : vector<8x16xf32>
    %75 = arith.negf %74 : vector<8x16xf32>
    %76 = math.exp %75 : vector<8x16xf32>
    %cst_48 = arith.constant 1.000000e+00 : f32
    %77 = vector.broadcast %cst_48 : f32 to vector<8x16xf32>
    %78 = arith.addf %77, %76 : vector<8x16xf32>
    %79 = arith.divf %77, %78 : vector<8x16xf32>
    %80 = arith.index_cast %66 : i32 to index
    %c0_49 = arith.constant 0 : index
    %81 = vector.load %arg9[%80, %c0_49] : memref<64x16xf32, #tpu.memory_space<vmem>>, vector<8x16xf32>
    %82 = arith.addf %81, %68 : vector<8x16xf32>
    %83 = arith.negf %82 : vector<8x16xf32>
    %84 = math.exp %83 : vector<8x16xf32>
    %cst_50 = arith.constant 1.000000e+00 : f32
    %85 = vector.broadcast %cst_50 : f32 to vector<8x16xf32>
    %86 = arith.addf %85, %84 : vector<8x16xf32>
    %87 = arith.divf %85, %86 : vector<8x16xf32>
    %88 = arith.index_cast %66 : i32 to index
    %c0_51 = arith.constant 0 : index
    %89 = vector.load %arg10[%88, %c0_51] : memref<64x16xf32, #tpu.memory_space<vmem>>, vector<8x16xf32>
    %90 = arith.mulf %79, %71 : vector<8x16xf32>
    %91 = arith.addf %89, %90 : vector<8x16xf32>
    %92 = math.tanh %91 : vector<8x16xf32>
    %cst_52 = arith.constant 1.000000e+00 : f32
    %93 = vector.broadcast %cst_52 : f32 to vector<8x16xf32>
    %94 = arith.subf %93, %87 : vector<8x16xf32>
    %95 = arith.mulf %94, %92 : vector<8x16xf32>
    %96 = arith.mulf %87, %62 : vector<8x16xf32>
    %97 = arith.addf %95, %96 : vector<8x16xf32>
    %98 = arith.index_cast %66 : i32 to index
    %c0_53 = arith.constant 0 : index
    %99 = vector.load %arg11[%98, %c0_53] : memref<64x16xf32, #tpu.memory_space<vmem>>, vector<8x16xf32>
    tpu.vector_store %arg11[%98, %c0_53], %97 {strides = array<i32>} : memref<64x16xf32, #tpu.memory_space<vmem>>, vector<8x16xf32>,
    %c2_i32 = arith.constant 2 : i32
    %c8_i32_54 = arith.constant 8 : i32
    %100 = arith.muli %c2_i32, %c8_i32_54 : i32
    %101 = tpu.assume_multiple %100, 8 : i32
    %cst_55 = arith.constant dense<0.000000e+00> : vector<8x16xf32>
    %102 = tpu.matmul %97, %23, %cst_55 {dimension_numbers = #tpu.dot_dimension_numbers<[1], [0], [0], [1], [0, 0, 1, 1], [], []>} : vector<8x16xf32>, vector<16x16xf32>, vector<8x16xf32> -> vector<8x16xf32>
    %cst_56 = arith.constant dense<0.000000e+00> : vector<8x16xf32>
    %103 = tpu.matmul %97, %25, %cst_56 {dimension_numbers = #tpu.dot_dimension_numbers<[1], [0], [0], [1], [0, 0, 1, 1], [], []>} : vector<8x16xf32>, vector<16x16xf32>, vector<8x16xf32> -> vector<8x16xf32>
    %cst_57 = arith.constant dense<0.000000e+00> : vector<8x16xf32>
    %104 = tpu.matmul %97, %27, %cst_57 {dimension_numbers = #tpu.dot_dimension_numbers<[1], [0], [0], [1], [0, 0, 1, 1], [], []>} : vector<8x16xf32>, vector<16x16xf32>, vector<8x16xf32> -> vector<8x16xf32>
    %105 = vector.broadcast %28 : vector<1x16xf32> to vector<8x16xf32>
    %106 = arith.addf %104, %105 : vector<8x16xf32>
    %107 = arith.index_cast %101 : i32 to index
    %c0_58 = arith.constant 0 : index
    %108 = vector.load %arg8[%107, %c0_58] : memref<64x16xf32, #tpu.memory_space<vmem>>, vector<8x16xf32>
    %109 = arith.addf %108, %102 : vector<8x16xf32>
    %110 = arith.negf %109 : vector<8x16xf32>
    %111 = math.exp %110 : vector<8x16xf32>
    %cst_59 = arith.constant 1.000000e+00 : f32
    %112 = vector.broadcast %cst_59 : f32 to vector<8x16xf32>
    %113 = arith.addf %112, %111 : vector<8x16xf32>
    %114 = arith.divf %112, %113 : vector<8x16xf32>
    %115 = arith.index_cast %101 : i32 to index
    %c0_60 = arith.constant 0 : index
    %116 = vector.load %arg9[%115, %c0_60] : memref<64x16xf32, #tpu.memory_space<vmem>>, vector<8x16xf32>
    %117 = arith.addf %116, %103 : vector<8x16xf32>
    %118 = arith.negf %117 : vector<8x16xf32>
    %119 = math.exp %118 : vector<8x16xf32>
    %cst_61 = arith.constant 1.000000e+00 : f32
    %120 = vector.broadcast %cst_61 : f32 to vector<8x16xf32>
    %121 = arith.addf %120, %119 : vector<8x16xf32>
    %122 = arith.divf %120, %121 : vector<8x16xf32>
    %123 = arith.index_cast %101 : i32 to index
    %c0_62 = arith.constant 0 : index
    %124 = vector.load %arg10[%123, %c0_62] : memref<64x16xf32, #tpu.memory_space<vmem>>, vector<8x16xf32>
    %125 = arith.mulf %114, %106 : vector<8x16xf32>
    %126 = arith.addf %124, %125 : vector<8x16xf32>
    %127 = math.tanh %126 : vector<8x16xf32>
    %cst_63 = arith.constant 1.000000e+00 : f32
    %128 = vector.broadcast %cst_63 : f32 to vector<8x16xf32>
    %129 = arith.subf %128, %122 : vector<8x16xf32>
    %130 = arith.mulf %129, %127 : vector<8x16xf32>
    %131 = arith.mulf %122, %97 : vector<8x16xf32>
    %132 = arith.addf %130, %131 : vector<8x16xf32>
    %133 = arith.index_cast %101 : i32 to index
    %c0_64 = arith.constant 0 : index
    %134 = vector.load %arg11[%133, %c0_64] : memref<64x16xf32, #tpu.memory_space<vmem>>, vector<8x16xf32>
    tpu.vector_store %arg11[%133, %c0_64], %132 {strides = array<i32>} : memref<64x16xf32, #tpu.memory_space<vmem>>, vector<8x16xf32>,
    %c3_i32 = arith.constant 3 : i32
    %c8_i32_65 = arith.constant 8 : i32
    %135 = arith.muli %c3_i32, %c8_i32_65 : i32
    %136 = tpu.assume_multiple %135, 8 : i32
    %cst_66 = arith.constant dense<0.000000e+00> : vector<8x16xf32>
    %137 = tpu.matmul %132, %23, %cst_66 {dimension_numbers = #tpu.dot_dimension_numbers<[1], [0], [0], [1], [0, 0, 1, 1], [], []>} : vector<8x16xf32>, vector<16x16xf32>, vector<8x16xf32> -> vector<8x16xf32>
    %cst_67 = arith.constant dense<0.000000e+00> : vector<8x16xf32>
    %138 = tpu.matmul %132, %25, %cst_67 {dimension_numbers = #tpu.dot_dimension_numbers<[1], [0], [0], [1], [0, 0, 1, 1], [], []>} : vector<8x16xf32>, vector<16x16xf32>, vector<8x16xf32> -> vector<8x16xf32>
    %cst_68 = arith.constant dense<0.000000e+00> : vector<8x16xf32>
    %139 = tpu.matmul %132, %27, %cst_68 {dimension_numbers = #tpu.dot_dimension_numbers<[1], [0], [0], [1], [0, 0, 1, 1], [], []>} : vector<8x16xf32>, vector<16x16xf32>, vector<8x16xf32> -> vector<8x16xf32>
    %140 = vector.broadcast %28 : vector<1x16xf32> to vector<8x16xf32>
    %141 = arith.addf %139, %140 : vector<8x16xf32>
    %142 = arith.index_cast %136 : i32 to index
    %c0_69 = arith.constant 0 : index
    %143 = vector.load %arg8[%142, %c0_69] : memref<64x16xf32, #tpu.memory_space<vmem>>, vector<8x16xf32>
    %144 = arith.addf %143, %137 : vector<8x16xf32>
    %145 = arith.negf %144 : vector<8x16xf32>
    %146 = math.exp %145 : vector<8x16xf32>
    %cst_70 = arith.constant 1.000000e+00 : f32
    %147 = vector.broadcast %cst_70 : f32 to vector<8x16xf32>
    %148 = arith.addf %147, %146 : vector<8x16xf32>
    %149 = arith.divf %147, %148 : vector<8x16xf32>
    %150 = arith.index_cast %136 : i32 to index
    %c0_71 = arith.constant 0 : index
    %151 = vector.load %arg9[%150, %c0_71] : memref<64x16xf32, #tpu.memory_space<vmem>>, vector<8x16xf32>
    %152 = arith.addf %151, %138 : vector<8x16xf32>
    %153 = arith.negf %152 : vector<8x16xf32>
    %154 = math.exp %153 : vector<8x16xf32>
    %cst_72 = arith.constant 1.000000e+00 : f32
    %155 = vector.broadcast %cst_72 : f32 to vector<8x16xf32>
    %156 = arith.addf %155, %154 : vector<8x16xf32>
    %157 = arith.divf %155, %156 : vector<8x16xf32>
    %158 = arith.index_cast %136 : i32 to index
    %c0_73 = arith.constant 0 : index
    %159 = vector.load %arg10[%158, %c0_73] : memref<64x16xf32, #tpu.memory_space<vmem>>, vector<8x16xf32>
    %160 = arith.mulf %149, %141 : vector<8x16xf32>
    %161 = arith.addf %159, %160 : vector<8x16xf32>
    %162 = math.tanh %161 : vector<8x16xf32>
    %cst_74 = arith.constant 1.000000e+00 : f32
    %163 = vector.broadcast %cst_74 : f32 to vector<8x16xf32>
    %164 = arith.subf %163, %157 : vector<8x16xf32>
    %165 = arith.mulf %164, %162 : vector<8x16xf32>
    %166 = arith.mulf %157, %132 : vector<8x16xf32>
    %167 = arith.addf %165, %166 : vector<8x16xf32>
    %168 = arith.index_cast %136 : i32 to index
    %c0_75 = arith.constant 0 : index
    %169 = vector.load %arg11[%168, %c0_75] : memref<64x16xf32, #tpu.memory_space<vmem>>, vector<8x16xf32>
    tpu.vector_store %arg11[%168, %c0_75], %167 {strides = array<i32>} : memref<64x16xf32, #tpu.memory_space<vmem>>, vector<8x16xf32>,
    %c4_i32 = arith.constant 4 : i32
    %c8_i32_76 = arith.constant 8 : i32
    %170 = arith.muli %c4_i32, %c8_i32_76 : i32
    %171 = tpu.assume_multiple %170, 8 : i32
    %cst_77 = arith.constant dense<0.000000e+00> : vector<8x16xf32>
    %172 = tpu.matmul %167, %23, %cst_77 {dimension_numbers = #tpu.dot_dimension_numbers<[1], [0], [0], [1], [0, 0, 1, 1], [], []>} : vector<8x16xf32>, vector<16x16xf32>, vector<8x16xf32> -> vector<8x16xf32>
    %cst_78 = arith.constant dense<0.000000e+00> : vector<8x16xf32>
    %173 = tpu.matmul %167, %25, %cst_78 {dimension_numbers = #tpu.dot_dimension_numbers<[1], [0], [0], [1], [0, 0, 1, 1], [], []>} : vector<8x16xf32>, vector<16x16xf32>, vector<8x16xf32> -> vector<8x16xf32>
    %cst_79 = arith.constant dense<0.000000e+00> : vector<8x16xf32>
    %174 = tpu.matmul %167, %27, %cst_79 {dimension_numbers = #tpu.dot_dimension_numbers<[1], [0], [0], [1], [0, 0, 1, 1], [], []>} : vector<8x16xf32>, vector<16x16xf32>, vector<8x16xf32> -> vector<8x16xf32>
    %175 = vector.broadcast %28 : vector<1x16xf32> to vector<8x16xf32>
    %176 = arith.addf %174, %175 : vector<8x16xf32>
    %177 = arith.index_cast %171 : i32 to index
    %c0_80 = arith.constant 0 : index
    %178 = vector.load %arg8[%177, %c0_80] : memref<64x16xf32, #tpu.memory_space<vmem>>, vector<8x16xf32>
    %179 = arith.addf %178, %172 : vector<8x16xf32>
    %180 = arith.negf %179 : vector<8x16xf32>
    %181 = math.exp %180 : vector<8x16xf32>
    %cst_81 = arith.constant 1.000000e+00 : f32
    %182 = vector.broadcast %cst_81 : f32 to vector<8x16xf32>
    %183 = arith.addf %182, %181 : vector<8x16xf32>
    %184 = arith.divf %182, %183 : vector<8x16xf32>
    %185 = arith.index_cast %171 : i32 to index
    %c0_82 = arith.constant 0 : index
    %186 = vector.load %arg9[%185, %c0_82] : memref<64x16xf32, #tpu.memory_space<vmem>>, vector<8x16xf32>
    %187 = arith.addf %186, %173 : vector<8x16xf32>
    %188 = arith.negf %187 : vector<8x16xf32>
    %189 = math.exp %188 : vector<8x16xf32>
    %cst_83 = arith.constant 1.000000e+00 : f32
    %190 = vector.broadcast %cst_83 : f32 to vector<8x16xf32>
    %191 = arith.addf %190, %189 : vector<8x16xf32>
    %192 = arith.divf %190, %191 : vector<8x16xf32>
    %193 = arith.index_cast %171 : i32 to index
    %c0_84 = arith.constant 0 : index
    %194 = vector.load %arg10[%193, %c0_84] : memref<64x16xf32, #tpu.memory_space<vmem>>, vector<8x16xf32>
    %195 = arith.mulf %184, %176 : vector<8x16xf32>
    %196 = arith.addf %194, %195 : vector<8x16xf32>
    %197 = math.tanh %196 : vector<8x16xf32>
    %cst_85 = arith.constant 1.000000e+00 : f32
    %198 = vector.broadcast %cst_85 : f32 to vector<8x16xf32>
    %199 = arith.subf %198, %192 : vector<8x16xf32>
    %200 = arith.mulf %199, %197 : vector<8x16xf32>
    %201 = arith.mulf %192, %167 : vector<8x16xf32>
    %202 = arith.addf %200, %201 : vector<8x16xf32>
    %203 = arith.index_cast %171 : i32 to index
    %c0_86 = arith.constant 0 : index
    %204 = vector.load %arg11[%203, %c0_86] : memref<64x16xf32, #tpu.memory_space<vmem>>, vector<8x16xf32>
    tpu.vector_store %arg11[%203, %c0_86], %202 {strides = array<i32>} : memref<64x16xf32, #tpu.memory_space<vmem>>, vector<8x16xf32>,
    %c5_i32 = arith.constant 5 : i32
    %c8_i32_87 = arith.constant 8 : i32
    %205 = arith.muli %c5_i32, %c8_i32_87 : i32
    %206 = tpu.assume_multiple %205, 8 : i32
    %cst_88 = arith.constant dense<0.000000e+00> : vector<8x16xf32>
    %207 = tpu.matmul %202, %23, %cst_88 {dimension_numbers = #tpu.dot_dimension_numbers<[1], [0], [0], [1], [0, 0, 1, 1], [], []>} : vector<8x16xf32>, vector<16x16xf32>, vector<8x16xf32> -> vector<8x16xf32>
    %cst_89 = arith.constant dense<0.000000e+00> : vector<8x16xf32>
    %208 = tpu.matmul %202, %25, %cst_89 {dimension_numbers = #tpu.dot_dimension_numbers<[1], [0], [0], [1], [0, 0, 1, 1], [], []>} : vector<8x16xf32>, vector<16x16xf32>, vector<8x16xf32> -> vector<8x16xf32>
    %cst_90 = arith.constant dense<0.000000e+00> : vector<8x16xf32>
    %209 = tpu.matmul %202, %27, %cst_90 {dimension_numbers = #tpu.dot_dimension_numbers<[1], [0], [0], [1], [0, 0, 1, 1], [], []>} : vector<8x16xf32>, vector<16x16xf32>, vector<8x16xf32> -> vector<8x16xf32>
    %210 = vector.broadcast %28 : vector<1x16xf32> to vector<8x16xf32>
    %211 = arith.addf %209, %210 : vector<8x16xf32>
    %212 = arith.index_cast %206 : i32 to index
    %c0_91 = arith.constant 0 : index
    %213 = vector.load %arg8[%212, %c0_91] : memref<64x16xf32, #tpu.memory_space<vmem>>, vector<8x16xf32>
    %214 = arith.addf %213, %207 : vector<8x16xf32>
    %215 = arith.negf %214 : vector<8x16xf32>
    %216 = math.exp %215 : vector<8x16xf32>
    %cst_92 = arith.constant 1.000000e+00 : f32
    %217 = vector.broadcast %cst_92 : f32 to vector<8x16xf32>
    %218 = arith.addf %217, %216 : vector<8x16xf32>
    %219 = arith.divf %217, %218 : vector<8x16xf32>
    %220 = arith.index_cast %206 : i32 to index
    %c0_93 = arith.constant 0 : index
    %221 = vector.load %arg9[%220, %c0_93] : memref<64x16xf32, #tpu.memory_space<vmem>>, vector<8x16xf32>
    %222 = arith.addf %221, %208 : vector<8x16xf32>
    %223 = arith.negf %222 : vector<8x16xf32>
    %224 = math.exp %223 : vector<8x16xf32>
    %cst_94 = arith.constant 1.000000e+00 : f32
    %225 = vector.broadcast %cst_94 : f32 to vector<8x16xf32>
    %226 = arith.addf %225, %224 : vector<8x16xf32>
    %227 = arith.divf %225, %226 : vector<8x16xf32>
    %228 = arith.index_cast %206 : i32 to index
    %c0_95 = arith.constant 0 : index
    %229 = vector.load %arg10[%228, %c0_95] : memref<64x16xf32, #tpu.memory_space<vmem>>, vector<8x16xf32>
    %230 = arith.mulf %219, %211 : vector<8x16xf32>
    %231 = arith.addf %229, %230 : vector<8x16xf32>
    %232 = math.tanh %231 : vector<8x16xf32>
    %cst_96 = arith.constant 1.000000e+00 : f32
    %233 = vector.broadcast %cst_96 : f32 to vector<8x16xf32>
    %234 = arith.subf %233, %227 : vector<8x16xf32>
    %235 = arith.mulf %234, %232 : vector<8x16xf32>
    %236 = arith.mulf %227, %202 : vector<8x16xf32>
    %237 = arith.addf %235, %236 : vector<8x16xf32>
    %238 = arith.index_cast %206 : i32 to index
    %c0_97 = arith.constant 0 : index
    %239 = vector.load %arg11[%238, %c0_97] : memref<64x16xf32, #tpu.memory_space<vmem>>, vector<8x16xf32>
    tpu.vector_store %arg11[%238, %c0_97], %237 {strides = array<i32>} : memref<64x16xf32, #tpu.memory_space<vmem>>, vector<8x16xf32>,
    %c6_i32 = arith.constant 6 : i32
    %c8_i32_98 = arith.constant 8 : i32
    %240 = arith.muli %c6_i32, %c8_i32_98 : i32
    %241 = tpu.assume_multiple %240, 8 : i32
    %cst_99 = arith.constant dense<0.000000e+00> : vector<8x16xf32>
    %242 = tpu.matmul %237, %23, %cst_99 {dimension_numbers = #tpu.dot_dimension_numbers<[1], [0], [0], [1], [0, 0, 1, 1], [], []>} : vector<8x16xf32>, vector<16x16xf32>, vector<8x16xf32> -> vector<8x16xf32>
    %cst_100 = arith.constant dense<0.000000e+00> : vector<8x16xf32>
    %243 = tpu.matmul %237, %25, %cst_100 {dimension_numbers = #tpu.dot_dimension_numbers<[1], [0], [0], [1], [0, 0, 1, 1], [], []>} : vector<8x16xf32>, vector<16x16xf32>, vector<8x16xf32> -> vector<8x16xf32>
    %cst_101 = arith.constant dense<0.000000e+00> : vector<8x16xf32>
    %244 = tpu.matmul %237, %27, %cst_101 {dimension_numbers = #tpu.dot_dimension_numbers<[1], [0], [0], [1], [0, 0, 1, 1], [], []>} : vector<8x16xf32>, vector<16x16xf32>, vector<8x16xf32> -> vector<8x16xf32>
    %245 = vector.broadcast %28 : vector<1x16xf32> to vector<8x16xf32>
    %246 = arith.addf %244, %245 : vector<8x16xf32>
    %247 = arith.index_cast %241 : i32 to index
    %c0_102 = arith.constant 0 : index
    %248 = vector.load %arg8[%247, %c0_102] : memref<64x16xf32, #tpu.memory_space<vmem>>, vector<8x16xf32>
    %249 = arith.addf %248, %242 : vector<8x16xf32>
    %250 = arith.negf %249 : vector<8x16xf32>
    %251 = math.exp %250 : vector<8x16xf32>
    %cst_103 = arith.constant 1.000000e+00 : f32
    %252 = vector.broadcast %cst_103 : f32 to vector<8x16xf32>
    %253 = arith.addf %252, %251 : vector<8x16xf32>
    %254 = arith.divf %252, %253 : vector<8x16xf32>
    %255 = arith.index_cast %241 : i32 to index
    %c0_104 = arith.constant 0 : index
    %256 = vector.load %arg9[%255, %c0_104] : memref<64x16xf32, #tpu.memory_space<vmem>>, vector<8x16xf32>
    %257 = arith.addf %256, %243 : vector<8x16xf32>
    %258 = arith.negf %257 : vector<8x16xf32>
    %259 = math.exp %258 : vector<8x16xf32>
    %cst_105 = arith.constant 1.000000e+00 : f32
    %260 = vector.broadcast %cst_105 : f32 to vector<8x16xf32>
    %261 = arith.addf %260, %259 : vector<8x16xf32>
    %262 = arith.divf %260, %261 : vector<8x16xf32>
    %263 = arith.index_cast %241 : i32 to index
    %c0_106 = arith.constant 0 : index
    %264 = vector.load %arg10[%263, %c0_106] : memref<64x16xf32, #tpu.memory_space<vmem>>, vector<8x16xf32>
    %265 = arith.mulf %254, %246 : vector<8x16xf32>
    %266 = arith.addf %264, %265 : vector<8x16xf32>
    %267 = math.tanh %266 : vector<8x16xf32>
    %cst_107 = arith.constant 1.000000e+00 : f32
    %268 = vector.broadcast %cst_107 : f32 to vector<8x16xf32>
    %269 = arith.subf %268, %262 : vector<8x16xf32>
    %270 = arith.mulf %269, %267 : vector<8x16xf32>
    %271 = arith.mulf %262, %237 : vector<8x16xf32>
    %272 = arith.addf %270, %271 : vector<8x16xf32>
    %273 = arith.index_cast %241 : i32 to index
    %c0_108 = arith.constant 0 : index
    %274 = vector.load %arg11[%273, %c0_108] : memref<64x16xf32, #tpu.memory_space<vmem>>, vector<8x16xf32>
    tpu.vector_store %arg11[%273, %c0_108], %272 {strides = array<i32>} : memref<64x16xf32, #tpu.memory_space<vmem>>, vector<8x16xf32>,
    %c7_i32 = arith.constant 7 : i32
    %c8_i32_109 = arith.constant 8 : i32
    %275 = arith.muli %c7_i32, %c8_i32_109 : i32
    %276 = tpu.assume_multiple %275, 8 : i32
    %cst_110 = arith.constant dense<0.000000e+00> : vector<8x16xf32>
    %277 = tpu.matmul %272, %23, %cst_110 {dimension_numbers = #tpu.dot_dimension_numbers<[1], [0], [0], [1], [0, 0, 1, 1], [], []>} : vector<8x16xf32>, vector<16x16xf32>, vector<8x16xf32> -> vector<8x16xf32>
    %cst_111 = arith.constant dense<0.000000e+00> : vector<8x16xf32>
    %278 = tpu.matmul %272, %25, %cst_111 {dimension_numbers = #tpu.dot_dimension_numbers<[1], [0], [0], [1], [0, 0, 1, 1], [], []>} : vector<8x16xf32>, vector<16x16xf32>, vector<8x16xf32> -> vector<8x16xf32>
    %cst_112 = arith.constant dense<0.000000e+00> : vector<8x16xf32>
    %279 = tpu.matmul %272, %27, %cst_112 {dimension_numbers = #tpu.dot_dimension_numbers<[1], [0], [0], [1], [0, 0, 1, 1], [], []>} : vector<8x16xf32>, vector<16x16xf32>, vector<8x16xf32> -> vector<8x16xf32>
    %280 = vector.broadcast %28 : vector<1x16xf32> to vector<8x16xf32>
    %281 = arith.addf %279, %280 : vector<8x16xf32>
    %282 = arith.index_cast %276 : i32 to index
    %c0_113 = arith.constant 0 : index
    %283 = vector.load %arg8[%282, %c0_113] : memref<64x16xf32, #tpu.memory_space<vmem>>, vector<8x16xf32>
    %284 = arith.addf %283, %277 : vector<8x16xf32>
    %285 = arith.negf %284 : vector<8x16xf32>
    %286 = math.exp %285 : vector<8x16xf32>
    %cst_114 = arith.constant 1.000000e+00 : f32
    %287 = vector.broadcast %cst_114 : f32 to vector<8x16xf32>
    %288 = arith.addf %287, %286 : vector<8x16xf32>
    %289 = arith.divf %287, %288 : vector<8x16xf32>
    %290 = arith.index_cast %276 : i32 to index
    %c0_115 = arith.constant 0 : index
    %291 = vector.load %arg9[%290, %c0_115] : memref<64x16xf32, #tpu.memory_space<vmem>>, vector<8x16xf32>
    %292 = arith.addf %291, %278 : vector<8x16xf32>
    %293 = arith.negf %292 : vector<8x16xf32>
    %294 = math.exp %293 : vector<8x16xf32>
    %cst_116 = arith.constant 1.000000e+00 : f32
    %295 = vector.broadcast %cst_116 : f32 to vector<8x16xf32>
    %296 = arith.addf %295, %294 : vector<8x16xf32>
    %297 = arith.divf %295, %296 : vector<8x16xf32>
    %298 = arith.index_cast %276 : i32 to index
    %c0_117 = arith.constant 0 : index
    %299 = vector.load %arg10[%298, %c0_117] : memref<64x16xf32, #tpu.memory_space<vmem>>, vector<8x16xf32>
    %300 = arith.mulf %289, %281 : vector<8x16xf32>
    %301 = arith.addf %299, %300 : vector<8x16xf32>
    %302 = math.tanh %301 : vector<8x16xf32>
    %cst_118 = arith.constant 1.000000e+00 : f32
    %303 = vector.broadcast %cst_118 : f32 to vector<8x16xf32>
    %304 = arith.subf %303, %297 : vector<8x16xf32>
    %305 = arith.mulf %304, %302 : vector<8x16xf32>
    %306 = arith.mulf %297, %272 : vector<8x16xf32>
    %307 = arith.addf %305, %306 : vector<8x16xf32>
    %308 = arith.index_cast %276 : i32 to index
    %c0_119 = arith.constant 0 : index
    %309 = vector.load %arg11[%308, %c0_119] : memref<64x16xf32, #tpu.memory_space<vmem>>, vector<8x16xf32>
    tpu.vector_store %arg11[%308, %c0_119], %307 {strides = array<i32>} : memref<64x16xf32, #tpu.memory_space<vmem>>, vector<8x16xf32>,
    %c8_i32_120 = arith.constant 8 : i32
    %c0_121 = arith.constant 0 : index
    %c0_122 = arith.constant 0 : index
    %310 = vector.load %arg11[%c0_121, %c0_122] : memref<64x16xf32, #tpu.memory_space<vmem>>, vector<64x16xf32>
    %c0_123 = arith.constant 0 : index
    %c0_124 = arith.constant 0 : index
    %311 = vector.load %arg5[%c0_123, %c0_124] : memref<16x2xf32, #tpu.memory_space<vmem>>, vector<16x2xf32>
    %cst_125 = arith.constant dense<0.000000e+00> : vector<64x2xf32>
    %312 = tpu.matmul %310, %311, %cst_125 {dimension_numbers = #tpu.dot_dimension_numbers<[1], [0], [0], [1], [0, 0, 1, 1], [], []>} : vector<64x16xf32>, vector<16x2xf32>, vector<64x2xf32> -> vector<64x2xf32>
    %c0_126 = arith.constant 0 : index
    %c0_127 = arith.constant 0 : index
    %313 = vector.load %arg6[%c0_126, %c0_127] : memref<1x2xf32, #tpu.memory_space<vmem>>, vector<1x2xf32>
    %314 = vector.broadcast %313 : vector<1x2xf32> to vector<64x2xf32>
    %315 = arith.addf %312, %314 : vector<64x2xf32>
    %c0_128 = arith.constant 0 : index
    %c0_129 = arith.constant 0 : index
    %316 = vector.load %arg7[%c0_128, %c0_129] : memref<64x2xf32, #tpu.memory_space<vmem>>, vector<64x2xf32>
    tpu.vector_store %arg7[%c0_128, %c0_129], %315 {strides = array<i32>} : memref<64x2xf32, #tpu.memory_space<vmem>>, vector<64x2xf32>,
    return
  }
  func.func @transform_0(%arg0: i32) -> (i32, i32) {
    %c0_i32 = arith.constant 0 : i32
    %c0_i32_0 = arith.constant 0 : i32
    %c0_i32_1 = arith.constant 0 : i32
    return %c0_i32, %c0_i32_0 : i32, i32
  }
  func.func @transform_1(%arg0: i32) -> (i32, i32, i32) {
    %c0_i32 = arith.constant 0 : i32
    %c0_i32_0 = arith.constant 0 : i32
    %c0_i32_1 = arith.constant 0 : i32
    %c0_i32_2 = arith.constant 0 : i32
    return %c0_i32, %c0_i32_0, %c0_i32_1 : i32, i32, i32
  }
  func.func @transform_2(%arg0: i32) -> (i32, i32, i32) {
    %c0_i32 = arith.constant 0 : i32
    %c0_i32_0 = arith.constant 0 : i32
    %c0_i32_1 = arith.constant 0 : i32
    %c0_i32_2 = arith.constant 0 : i32
    return %c0_i32, %c0_i32_0, %c0_i32_1 : i32, i32, i32
  }
  func.func @transform_3(%arg0: i32) -> (i32, i32) {
    %c0_i32 = arith.constant 0 : i32
    %c0_i32_0 = arith.constant 0 : i32
    %c0_i32_1 = arith.constant 0 : i32
    return %c0_i32, %c0_i32_0 : i32, i32
  }
  func.func @transform_4(%arg0: i32) -> (i32, i32) {
    %c0_i32 = arith.constant 0 : i32
    %c0_i32_0 = arith.constant 0 : i32
    %c0_i32_1 = arith.constant 0 : i32
    return %c0_i32, %c0_i32_0 : i32, i32
  }
  func.func @transform_5(%arg0: i32) -> (i32, i32) {
    %c0_i32 = arith.constant 0 : i32
    %c0_i32_0 = arith.constant 0 : i32
    %c0_i32_1 = arith.constant 0 : i32
    return %c0_i32, %c0_i32_0 : i32, i32
  }
  func.func @transform_6(%arg0: i32) -> (i32, i32) {
    %c0_i32 = arith.constant 0 : i32
    %c0_i32_0 = arith.constant 0 : i32
    %c0_i32_1 = arith.constant 0 : i32
    return %c0_i32, %c0_i32_0 : i32, i32
  }
}

</mosaic_0001>

<bundles_post_ra>
// kernel: gru_linear_forward.1
= control target key start
LH: loop header
LB: loop body
LE: loop exit
PB: predicated region body
PF: predicated region fallthrough
CT: control target
= control target key end

     0   :  { %vm37_vm0 = vcmask 64512   ;;  %v3096_v8 = vmov 0.0|0.0   ;;  %vm3097_vm1 = vmmov 0   ;;  %v3098_v18 = vmov 0.0   ;;  %s3445_s1 = inlined_call_operand.vmem [shape: f32[3,8,16], index: 1, kind: input, shape index: {}]   ;;  %s3446_s0 = inlined_call_operand.vmem [shape: f32[64,8], index: 0, kind: input, shape index: {}]   ;;  %s3447_s2 = inlined_call_operand.vmem [shape: f32[3,16,16], index: 2, kind: input, shape index: {}]   ;;  %s3448_s3 = inlined_call_operand.vmem [shape: f32[4,16], index: 3, kind: input, shape index: {}]   ;;  %s3449_s4 = inlined_call_operand.vmem [shape: f32[16,2], index: 4, kind: input, shape index: {}]   ;;  %s3450_s5 = inlined_call_operand.vmem [shape: f32[1,2], index: 5, kind: input, shape index: {}]   ;;  %s3451_s6 = inlined_call_operand.vmem [shape: f32[64,2], index: 6, kind: output, shape index: {}]  }
   0x1   :  { %v31_v0 = vld [vmem:[%s3445_s1] sm:$0xff]  ;;  %v28_v2 = vld [vmem:[%s3446_s0 + $0x28] sm:$0xff]  ;;  %v29_v4 = vld [vmem:[%s3446_s0 + $0x30] sm:$0xff]  ;;  %vm167_vm2 = vcmask 130048   ;;  %vm2507_vm3 = vcmask 15360  }
   0x2   :  { %v27_v1 = vld [vmem:[%s3446_s0 + $0x20] sm:$0xff]  ;;  %3011 = vmatprep.subr.mxu1 %v31_v0  ;;  %v2529_v3 = vld [vmem:[%s3445_s1 + $0x8] sm:$0xff]  ;;  %2709 = vmatprep.subr.mxu0 %v31_v0  ;;  %v30_v5 = vld [vmem:[%s3446_s0 + $0x38] sm:$0xff] }
   0x3   :  { %2717 = vmatprep.mubr.msk.f32.mxu1 %vm37_vm0, %v27_v1  ;;  %3012 = vmatpush3.msra.mxu1 %v31_v0  ;;  %v2539_v6 = vld [vmem:[%s3445_s1 + $0x10] sm:$0xff]  ;;  %v23_v7 = vld [vmem:[%s3446_s0] sm:$0xff]  ;;  %v417_v10 = vld [vmem:[%s3447_s2 + $0x8] sm:$0xff] }
   0x4   :  { %2718 = vmatmul.mubr.msk.f32.vlgmr.msra.gmra.mrb[0].mxu1 %vm37_vm0, %v28_v2  ;;  %2723 = vmatprep.subr.mxu1 %v2529_v3  ;;  %v416_v9 = vld [vmem:[%s3447_s2] sm:$0xff]  ;;  %v24_v11 = vld [vmem:[%s3446_s0 + $0x8] sm:$0xff]  ;;  %v25_v13 = vld [vmem:[%s3446_s0 + $0x10] sm:$0xff] }
   0x5   :  { %2724 = vmatpush3.msra.mxu1 %v2529_v3  ;;  %2720 = vmatprep.mubr.msk.f32.mxu1 %vm37_vm0, %v29_v4  ;;  %v3175_v12 = vpack.c.bf16 %v417_v10, %v416_v9  ;;  %v26_v14 = vld [vmem:[%s3446_s0 + $0x18] sm:$0xff]  ;;  %v2549_v15 = vld [vmem:[%s3447_s2 + $0x10] sm:$0xff]  ;;  %v2551_v19 = vld [vmem:[%s3447_s2 + $0x20] sm:$0xff] }
   0x6   :  { %2935 = vmatprep.subr.bf16.mxu1 %v3096_v8  ;;  %2710 = vmatpush3.msra.mxu0 %v31_v0  ;;  %v2550_v16 = vld [vmem:[%s3447_s2 + $0x18] sm:$0xff]  ;;  %v2552_v20 = vld [vmem:[%s3447_s2 + $0x28] sm:$0xff]  ;;  %v2520_v22 = vld [vmem:[%s3448_s3] ss:$0 sm:$0xff] }
   0x7   :  { %2711 = vmatprep.mubr.msk.f32.mxu0 %vm37_vm0, %v23_v7  ;;  %2737 = vmatprep.subr.mxu0 %v2539_v6  ;;  %v3198_v17 = vpack.c.bf16 %v2550_v16, %v2549_v15  ;;  %v3225_v21 = vpack.c.bf16 %v2552_v20, %v2551_v19  ;;  %v2530_v34 = vld [vmem:[%s3448_s3 + $0x1] ss:$0 sm:$0xff]  ;;  %v2540_v44 = vld [vmem:[%s3448_s3 + $0x2] ss:$0 sm:$0xff] }
   0x8   :  { %2721 = vmatmul.mubr.msk.f32.gmra.mrb[2].mxu1 %vm37_vm0, %v30_v5  ;;  %2712 = vmatmul.mubr.msk.f32.vlgmr.msra.gmra.mrb[0].mxu0 %vm37_vm0, %v24_v11 }
   0x9   :  { %2725 = vmatprep.mubr.msk.f32.mxu1 %vm37_vm0, %v23_v7  ;;  %2738 = vmatpush3.msra.mxu0 %v2539_v6 }
   0xa   :  { %2714 = vmatprep.mubr.msk.f32.mxu0 %vm37_vm0, %v25_v13  ;;  %2947 = vmatprep.subr.bf16.mxu0 %v3096_v8 }
   0xc   :  { %2726 = vmatmul.mubr.msk.f32.vlgmr.msra.gmra.mrb[4].mxu1 %vm37_vm0, %v24_v11  ;;  %2715 = vmatmul.mubr.msk.f32.gmra.mrb[2].mxu0 %vm37_vm0, %v26_v14 }
   0xd   :  { %2937 = vmatpush3.bf16.msra.mxu1 %v3175_v12  ;;  %2728 = vmatprep.mubr.msk.f32.mxu1 %vm37_vm0, %v25_v13 }
   0xe   :  { %2938 = vmatprep.subr.bf16.mxu1 %v3096_v8  ;;  %2739 = vmatprep.mubr.msk.f32.mxu0 %vm37_vm0, %v23_v7 }
  0x10   :  { %2729 = vmatmul.mubr.msk.f32.gmra.mrb[6].mxu1 %vm37_vm0, %v26_v14  ;;  %2740 = vmatmul.mubr.msk.f32.vlgmr.msra.gmra.mrb[4].mxu0 %vm37_vm0, %v24_v11 }
  0x11   :  { %2731 = vmatprep.mubr.msk.f32.mxu1 %vm37_vm0, %v27_v1  ;;  %2742 = vmatprep.mubr.msk.f32.mxu0 %vm37_vm0, %v25_v13 }
  0x12   :  { %2949 = vmatpush3.bf16.msra.mxu0 %v3198_v17 }
  0x13   :  { %2953 = vmatprep.subr.bf16.mxu0 %v3096_v8 }
  0x14   :  { %2732 = vmatmul.mubr.msk.f32.gmra.mrb[8].mxu1 %vm37_vm0, %v28_v2  ;;  %2743 = vmatmul.mubr.msk.f32.gmra.mrb[6].mxu0 %vm37_vm0, %v26_v14 }
  0x15   :  { %2734 = vmatprep.mubr.msk.f32.mxu1 %vm37_vm0, %v29_v4  ;;  %2745 = vmatprep.mubr.msk.f32.mxu0 %vm37_vm0, %v27_v1 }
  0x18   :  { %2735 = vmatmul.mubr.msk.f32.gmra.mrb[10].mxu1 %vm37_vm0, %v30_v5  ;;  %2746 = vmatmul.mubr.msk.f32.gmra.mrb[8].mxu0 %vm37_vm0, %v28_v2 }
  0x19   :  { %2755 = vmatprep.mubr.msk.f32.mxu1 %vm3097_vm1, %v3098_v18  ;;  %2748 = vmatprep.mubr.msk.f32.mxu0 %vm37_vm0, %v29_v4 }
  0x1c   :  { %2756 = vmatmul.mubr.f32.vlgmr.msra.gmra.mrb[12].mxu1 %v3098_v18  ;;  %2749 = vmatmul.mubr.msk.f32.gmra.mrb[10].mxu0 %vm37_vm0, %v30_v5 }
  0x1d   :  { %2940 = vmatpush3.bf16.msra.mxu1 %v3198_v17  ;;  %2762 = vmatprep.mubr.msk.f32.mxu1 %vm3097_vm1, %v3098_v18 }
  0x1e   :  { %2941 = vmatprep.subr.bf16.mxu1 %v3096_v8  ;;  %2783 = vmatprep.mubr.msk.f32.mxu0 %vm3097_vm1, %v3098_v18 }
  0x20   :  { %2763 = vmatmul.mubr.f32.vlgmr.msra.gmra.mrb[14].mxu1 %v3098_v18 }
  0x21   :  { %2943 = vmatpush3.bf16.msra.mxu1 %v3225_v21  ;;  %2769 = vmatprep.mubr.msk.f32.mxu1 %vm3097_vm1, %v3098_v18 }
  0x22   :  { %2944 = vmatprep.subr.bf16.mxu1 %v3096_v8 }
  0x24   :  { %2770 = vmatmul.mubr.f32.vlgmr.msra.gmra.mrb[16].mxu1 %v3098_v18 }
  0x25   :  { %2946 = vmatpush3.bf16.msra.mxu1 %v3175_v12  ;;  %2776 = vmatprep.mubr.msk.f32.mxu1 %vm3097_vm1, %v3098_v18 }
  0x26   :  { %2950 = vmatprep.subr.bf16.mxu1 %v3096_v8 }
  0xd7   :  { %v2719_v23 = vpop.f32.mrb[0].mxu1 }
  0xd8   :  { %v154_v24 = vadd.f32 %v2719_v23, %v2520_v22  ;;  %v148_v25 = vpop.f32.mrb[1].mxu1 }
  0xd9   :  { %v149_v26 = vadd.f32 %v2520_v22, %v148_v25 }
  0xda   :  { %173 = vst.msk [vmem:[#allocation2 + $0x28] sm:$0xff] %vm167_vm2, %v154_v24 }
  0xdb   :  { %172 = vst.msk [vmem:[#allocation2 + $0x20] sm:$0xff] %vm167_vm2, %v149_v26  ;;  %v2722_v27 = vpop.f32.mrb[2].mxu1  ;;  %v2713_v28 = vpop.f32.mrb[0].mxu0 }
  0xdc   :  { %v164_v29 = vadd.f32 %v2722_v27, %v2520_v22  ;;  %v158_v30 = vpop.f32.mrb[3].mxu1  ;;  %v134_v31 = vadd.f32 %v2713_v28, %v2520_v22  ;;  %v128_v32 = vpop.f32.mrb[1].mxu0 }
  0xdd   :  { %v159_v33 = vadd.f32 %v2520_v22, %v158_v30  ;;  %v129_v35 = vadd.f32 %v2520_v22, %v128_v32 }
  0xde   :  { %175 = vst.msk [vmem:[#allocation2 + $0x38] sm:$0xff] %vm167_vm2, %v164_v29  ;;  %169 = vst.msk [vmem:[#allocation2 + $0x8] sm:$0xff] %vm167_vm2, %v134_v31  ;;  %v3276_v29 = vld [vmem:[%s3448_s3 + $0x3] ss:$0 sm:$0xff] }
  0xdf   :  { %174 = vst.msk [vmem:[#allocation2 + $0x30] sm:$0xff] %vm167_vm2, %v159_v33  ;;  %v2727_v36 = vpop.f32.mrb[4].mxu1  ;;  %168 = vst.msk [vmem:[#allocation2] sm:$0xff] %vm167_vm2, %v129_v35  ;;  %v2716_v37 = vpop.f32.mrb[2].mxu0 }
  0xe0   :  { %v255_v38 = vadd.f32 %v2727_v36, %v2530_v34  ;;  %v249_v39 = vpop.f32.mrb[5].mxu1  ;;  %v144_v40 = vadd.f32 %v2716_v37, %v2520_v22  ;;  %v138_v41 = vpop.f32.mrb[3].mxu0 }
  0xe1   :  { %v250_v42 = vadd.f32 %v2530_v34, %v249_v39  ;;  %v139_v43 = vadd.f32 %v2520_v22, %v138_v41 }
  0xe2   :  { %289 = vst.msk [vmem:[#allocation3 + $0x8] sm:$0xff] %vm167_vm2, %v255_v38  ;;  %171 = vst.msk [vmem:[#allocation2 + $0x18] sm:$0xff] %vm167_vm2, %v144_v40 }
  0xe3   :  { %288 = vst.msk [vmem:[#allocation3] sm:$0xff] %vm167_vm2, %v250_v42  ;;  %v2730_v45 = vpop.f32.mrb[6].mxu1  ;;  %170 = vst.msk [vmem:[#allocation2 + $0x10] sm:$0xff] %vm167_vm2, %v139_v43  ;;  %v2741_v46 = vpop.f32.mrb[4].mxu0 }
  0xe4   :  { %v265_v47 = vadd.f32 %v2730_v45, %v2530_v34  ;;  %v259_v48 = vpop.f32.mrb[7].mxu1  ;;  %v375_v49 = vadd.f32 %v2741_v46, %v2540_v44  ;;  %v369_v50 = vpop.f32.mrb[5].mxu0 }
  0xe5   :  { %v260_v51 = vadd.f32 %v2530_v34, %v259_v48  ;;  %v370_v52 = vadd.f32 %v2540_v44, %v369_v50  ;;  %v881_v43 = vld [vmem:[#allocation2 + $0x8] sm:$0xff] }
  0xe6   :  { %291 = vst.msk [vmem:[#allocation3 + $0x18] sm:$0xff] %vm167_vm2, %v265_v47  ;;  %409 = vst.msk [vmem:[#allocation4 + $0x8] sm:$0xff] %vm167_vm2, %v375_v49  ;;  %v642_v4 = vld [vmem:[#allocation2] sm:$0xff] }
  0xe7   :  { %290 = vst.msk [vmem:[#allocation3 + $0x10] sm:$0xff] %vm167_vm2, %v260_v51  ;;  %v2733_v53 = vpop.f32.mrb[8].mxu1  ;;  %408 = vst.msk [vmem:[#allocation4] sm:$0xff] %vm167_vm2, %v370_v52  ;;  %v2744_v54 = vpop.f32.mrb[6].mxu0 }
  0xe8   :  { %v275_v55 = vadd.f32 %v2733_v53, %v2530_v34  ;;  %v269_v56 = vpop.f32.mrb[9].mxu1  ;;  %v385_v57 = vadd.f32 %v2744_v54, %v2540_v44  ;;  %v379_v58 = vpop.f32.mrb[7].mxu0 }
  0xe9   :  { %v270_v59 = vadd.f32 %v2530_v34, %v269_v56  ;;  %v380_v60 = vadd.f32 %v2540_v44, %v379_v58  ;;  %v890_v49 = vld [vmem:[#allocation3 + $0x8] sm:$0xff] }
  0xea   :  { %293 = vst.msk [vmem:[#allocation3 + $0x28] sm:$0xff] %vm167_vm2, %v275_v55  ;;  %411 = vst.msk [vmem:[#allocation4 + $0x18] sm:$0xff] %vm167_vm2, %v385_v57  ;;  %v650_v19 = vld [vmem:[#allocation3] sm:$0xff] }
  0xeb   :  { %292 = vst.msk [vmem:[#allocation3 + $0x20] sm:$0xff] %vm167_vm2, %v270_v59  ;;  %v2736_v61 = vpop.f32.mrb[10].mxu1  ;;  %410 = vst.msk [vmem:[#allocation4 + $0x10] sm:$0xff] %vm167_vm2, %v380_v60  ;;  %v2747_v62 = vpop.f32.mrb[8].mxu0 }
  0xec   :  { %v285_v63 = vadd.f32 %v2736_v61, %v2530_v34  ;;  %v279_v0 = vpop.f32.mrb[11].mxu1  ;;  %v395_v1 = vadd.f32 %v2747_v62, %v2540_v44  ;;  %v389_v2 = vpop.f32.mrb[9].mxu0 }
  0xed   :  { %v280_v3 = vadd.f32 %v2530_v34, %v279_v0  ;;  %v390_v5 = vadd.f32 %v2540_v44, %v389_v2  ;;  %v899_v61 = vld [vmem:[#allocation4 + $0x8] sm:$0xff] }
  0xee   :  { %295 = vst.msk [vmem:[#allocation3 + $0x38] sm:$0xff] %vm167_vm2, %v285_v63  ;;  %413 = vst.msk [vmem:[#allocation4 + $0x28] sm:$0xff] %vm167_vm2, %v395_v1  ;;  %v658_v33 = vld [vmem:[#allocation4] sm:$0xff] }
  0xef   :  { %294 = vst.msk [vmem:[#allocation3 + $0x30] sm:$0xff] %vm167_vm2, %v280_v3  ;;  %v494_v6 = vpop.f32.mrb[12].mxu1  ;;  %412 = vst.msk [vmem:[#allocation4 + $0x20] sm:$0xff] %vm167_vm2, %v390_v5  ;;  %v2750_v7 = vpop.f32.mrb[10].mxu0 }
  0xf0   :  { %v643_v9 = vadd.f32 %v642_v4, %v494_v6  ;;  %v2757_v10 = vpop.f32.mrb[13].mxu1  ;;  %v405_v11 = vadd.f32 %v2750_v7, %v2540_v44  ;;  %v399_v13 = vpop.f32.mrb[11].mxu0  ;;  %v1123_v6 = vld [vmem:[#allocation2 + $0x10] sm:$0xff] }
  0xf1   :  { %v400_v14 = vadd.f32 %v2540_v44, %v399_v13 }
  0xf2   :  { %v2554_v15 = vmul.f32 -1.442695, %v643_v9  ;;  %415 = vst.msk [vmem:[#allocation4 + $0x38] sm:$0xff] %vm167_vm2, %v405_v11 }
  0xf3   :  { %v564_v16 = vpop.f32.mrb[14].mxu1  ;;  %414 = vst.msk [vmem:[#allocation4 + $0x30] sm:$0xff] %vm167_vm2, %v400_v14  ;;  %v1132_v14 = vld [vmem:[#allocation3 + $0x10] sm:$0xff] }
  0xf4   :  { %3016 = vpow2.f32 %v2554_v15  ;;  %v651_v20 = vadd.f32 %v650_v19, %v564_v16  ;;  %v2764_v22 = vpop.f32.mrb[15].mxu1 }
  0xf6   :  { %v2555_v23 = vmul.f32 -1.442695, %v651_v20 }
  0xf7   :  { %v638_v24 = vpop.f32.mrb[16].mxu1 }
  0xf8   :  { %v2771_v25 = vpop.f32.mrb[17].mxu1  ;;  %3018 = vpow2.f32 %v2555_v23  ;;  %v639_v31 = vadd.f32 %v3276_v29, %v638_v24 }
  0xfe   :  { %v3017_v26 = vpop.eup %3016 }
  0xff   :  { %v647_v27 = vadd.f32 1.0, %v3017_v26 }
 0x101   :  { %3020 = vrcp.f32 %v647_v27 }
 0x102   :  { %v3019_v28 = vpop.eup %3018 }
 0x103   :  { %v655_v30 = vadd.f32 1.0, %v3019_v28 }
 0x105   :  { %3022 = vrcp.f32 %v655_v30  ;;  %v1141_v30 = vld [vmem:[#allocation4 + $0x10] sm:$0xff] }
 0x10b   :  { %v3021_v32 = vpop.eup %3020 }
 0x10c   :  { %v659_v34 = vmul.f32 %v3021_v32, %v639_v31 }
 0x10e   :  { %v660_v35 = vadd.f32 %v659_v34, %v658_v33 }
 0x10f   :  { %v3023_v36 = vpop.eup %3022 }
 0x110   :  { %3024 = vtanh.f32 %v660_v35  ;;  %v662_v37 = vsub.f32 1.0, %v3023_v36  ;;  %v664_v40 = vmul.f32 0.0, %v3023_v36 }
 0x11a   :  { %v3025_v38 = vpop.eup %3024 }
 0x11b   :  { %v663_v39 = vmul.f32 %v3025_v38, %v662_v37 }
 0x11d   :  { %v665_v41 = vadd.f32 %v664_v40, %v663_v39  ;;  %v1365_v39 = vld [vmem:[#allocation2 + $0x18] sm:$0xff] }
 0x11f   :  { %666 = vst.msk [vmem:[#allocation5] sm:$0xff] %vm167_vm2, %v665_v41  ;;  %2777 = vmatmul.mubr.msk.f32.vlgmr.msra.gmra.mrb[18].mxu1 %vm167_vm2, %v665_v41  ;;  %2784 = vmatmul.mubr.msk.f32.vlgmr.msra.gmra.mrb[12].mxu0 %vm167_vm2, %v665_v41 }
 0x120   :  { %2952 = vmatpush3.bf16.msra.mxu1 %v3225_v21  ;;  %2790 = vmatprep.mubr.msk.f32.mxu1 %vm3097_vm1, %v3098_v18 }
 0x121   :  { %2956 = vmatprep.subr.bf16.mxu1 %v3096_v8  ;;  %2955 = vmatpush3.bf16.msra.mxu0 %v3175_v12 }
 0x122   :  { %2797 = vmatprep.mubr.msk.f32.mxu0 %vm3097_vm1, %v3098_v18  ;;  %2959 = vmatprep.subr.bf16.mxu0 %v3096_v8 }
 0x123   :  { %2791 = vmatmul.mubr.msk.f32.vlgmr.msra.gmra.mrb[20].mxu1 %vm167_vm2, %v665_v41 }
 0x124   :  { %2958 = vmatpush3.bf16.msra.mxu1 %v3198_v17  ;;  %2804 = vmatprep.mubr.msk.f32.mxu1 %vm3097_vm1, %v3098_v18 }
 0x125   :  { %2962 = vmatprep.subr.bf16.mxu1 %v3096_v8 }
 0x1f2   :  { %v736_v42 = vpop.f32.mrb[18].mxu1  ;;  %v806_v44 = vpop.f32.mrb[12].mxu0 }
 0x1f3   :  { %v882_v45 = vadd.f32 %v881_v43, %v736_v42  ;;  %v2778_v46 = vpop.f32.mrb[19].mxu1  ;;  %v2785_v47 = vpop.f32.mrb[13].mxu0  ;;  %v891_v50 = vadd.f32 %v890_v49, %v806_v44 }
 0x1f5   :  { %v2559_v48 = vmul.f32 -1.442695, %v882_v45  ;;  %v2560_v53 = vmul.f32 -1.442695, %v891_v50  ;;  %v1374_v45 = vld [vmem:[#allocation3 + $0x18] sm:$0xff] }
 0x1f6   :  { %v876_v51 = vpop.f32.mrb[20].mxu1 }
 0x1f7   :  { %3026 = vpow2.f32 %v2559_v48  ;;  %v2792_v52 = vpop.f32.mrb[21].mxu1  ;;  %v877_v58 = vadd.f32 %v3276_v29, %v876_v51 }
 0x1f8   :  { %3028 = vpow2.f32 %v2560_v53 }
 0x201   :  { %v3027_v54 = vpop.eup %3026 }
 0x202   :  { %v886_v55 = vadd.f32 1.0, %v3027_v54  ;;  %v3029_v56 = vpop.eup %3028 }
 0x203   :  { %v895_v57 = vadd.f32 1.0, %v3029_v56 }
 0x204   :  { %3030 = vrcp.f32 %v886_v55 }
 0x205   :  { %3032 = vrcp.f32 %v895_v57  ;;  %v1383_v57 = vld [vmem:[#allocation4 + $0x18] sm:$0xff] }
 0x20e   :  { %v3031_v59 = vpop.eup %3030 }
 0x20f   :  { %v900_v60 = vmul.f32 %v3031_v59, %v877_v58  ;;  %v3033_v63 = vpop.eup %3032 }
 0x210   :  { %v903_v0 = vsub.f32 1.0, %v3033_v63  ;;  %v905_v3 = vmul.f32 %v3033_v63, %v665_v41 }
 0x211   :  { %v901_v62 = vadd.f32 %v900_v60, %v899_v61 }
 0x213   :  { %3034 = vtanh.f32 %v901_v62 }
 0x21d   :  { %v3035_v1 = vpop.eup %3034 }
 0x21e   :  { %v904_v2 = vmul.f32 %v3035_v1, %v903_v0 }
 0x220   :  { %v906_v4 = vadd.f32 %v905_v3, %v904_v2  ;;  %v1607_v2 = vld [vmem:[#allocation2 + $0x20] sm:$0xff] }
 0x222   :  { %908 = vst.msk [vmem:[#allocation5 + $0x8] sm:$0xff] %vm167_vm2, %v906_v4  ;;  %2798 = vmatmul.mubr.msk.f32.vlgmr.msra.gmra.mrb[14].mxu0 %vm167_vm2, %v906_v4  ;;  %2805 = vmatmul.mubr.msk.f32.vlgmr.msra.gmra.mrb[22].mxu1 %vm167_vm2, %v906_v4 }
 0x223   :  { %2961 = vmatpush3.bf16.msra.mxu0 %v3225_v21  ;;  %2811 = vmatprep.mubr.msk.f32.mxu0 %vm3097_vm1, %v3098_v18 }
 0x224   :  { %2965 = vmatprep.subr.bf16.mxu0 %v3096_v8  ;;  %2964 = vmatpush3.bf16.msra.mxu1 %v3175_v12 }
 0x225   :  { %2818 = vmatprep.mubr.msk.f32.mxu1 %vm3097_vm1, %v3098_v18  ;;  %2968 = vmatprep.subr.bf16.mxu1 %v3096_v8 }
 0x226   :  { %2812 = vmatmul.mubr.msk.f32.vlgmr.msra.gmra.mrb[16].mxu0 %vm167_vm2, %v906_v4 }
 0x227   :  { %2967 = vmatpush3.bf16.msra.mxu0 %v3198_v17  ;;  %2825 = vmatprep.mubr.msk.f32.mxu0 %vm3097_vm1, %v3098_v18 }
 0x228   :  { %2971 = vmatprep.subr.bf16.mxu0 %v3096_v8 }
 0x2f5   :  { %v978_v5 = vpop.f32.mrb[14].mxu0  ;;  %v1048_v7 = vpop.f32.mrb[22].mxu1 }
 0x2f6   :  { %v1124_v9 = vadd.f32 %v1123_v6, %v978_v5  ;;  %v2799_v10 = vpop.f32.mrb[15].mxu0  ;;  %v2806_v11 = vpop.f32.mrb[23].mxu1  ;;  %v1133_v15 = vadd.f32 %v1132_v14, %v1048_v7 }
 0x2f8   :  { %v2564_v13 = vmul.f32 -1.442695, %v1124_v9  ;;  %v2565_v20 = vmul.f32 -1.442695, %v1133_v15  ;;  %v1616_v9 = vld [vmem:[#allocation3 + $0x20] sm:$0xff] }
 0x2f9   :  { %v1118_v16 = vpop.f32.mrb[16].mxu0 }
 0x2fa   :  { %3036 = vpow2.f32 %v2564_v13  ;;  %v2813_v19 = vpop.f32.mrb[17].mxu0  ;;  %v1119_v26 = vadd.f32 %v3276_v29, %v1118_v16 }
 0x2fb   :  { %3038 = vpow2.f32 %v2565_v20 }
 0x304   :  { %v3037_v22 = vpop.eup %3036 }
 0x305   :  { %v1128_v23 = vadd.f32 1.0, %v3037_v22  ;;  %v3039_v24 = vpop.eup %3038 }
 0x306   :  { %v1137_v25 = vadd.f32 1.0, %v3039_v24 }
 0x307   :  { %3040 = vrcp.f32 %v1128_v23 }
 0x308   :  { %3042 = vrcp.f32 %v1137_v25  ;;  %v1625_v25 = vld [vmem:[#allocation4 + $0x20] sm:$0xff] }
 0x311   :  { %v3041_v27 = vpop.eup %3040 }
 0x312   :  { %v1142_v28 = vmul.f32 %v3041_v27, %v1119_v26  ;;  %v3043_v32 = vpop.eup %3042 }
 0x313   :  { %v1145_v33 = vsub.f32 1.0, %v3043_v32  ;;  %v1147_v36 = vmul.f32 %v3043_v32, %v906_v4 }
 0x314   :  { %v1143_v31 = vadd.f32 %v1142_v28, %v1141_v30 }
 0x316   :  { %3044 = vtanh.f32 %v1143_v31 }
 0x320   :  { %v3045_v34 = vpop.eup %3044 }
 0x321   :  { %v1146_v35 = vmul.f32 %v3045_v34, %v1145_v33 }
 0x323   :  { %v1148_v37 = vadd.f32 %v1147_v36, %v1146_v35  ;;  %v1849_v35 = vld [vmem:[#allocation2 + $0x28] sm:$0xff] }
 0x325   :  { %1150 = vst.msk [vmem:[#allocation5 + $0x10] sm:$0xff] %vm167_vm2, %v1148_v37  ;;  %2819 = vmatmul.mubr.msk.f32.vlgmr.msra.gmra.mrb[24].mxu1 %vm167_vm2, %v1148_v37  ;;  %2826 = vmatmul.mubr.msk.f32.vlgmr.msra.gmra.mrb[18].mxu0 %vm167_vm2, %v1148_v37 }
 0x326   :  { %2970 = vmatpush3.bf16.msra.mxu1 %v3225_v21  ;;  %2832 = vmatprep.mubr.msk.f32.mxu1 %vm3097_vm1, %v3098_v18 }
 0x327   :  { %2974 = vmatprep.subr.bf16.mxu1 %v3096_v8  ;;  %2973 = vmatpush3.bf16.msra.mxu0 %v3175_v12 }
 0x328   :  { %2839 = vmatprep.mubr.msk.f32.mxu0 %vm3097_vm1, %v3098_v18  ;;  %2977 = vmatprep.subr.bf16.mxu0 %v3096_v8 }
 0x329   :  { %2833 = vmatmul.mubr.msk.f32.vlgmr.msra.gmra.mrb[26].mxu1 %vm167_vm2, %v1148_v37 }
 0x32a   :  { %2976 = vmatpush3.bf16.msra.mxu1 %v3198_v17  ;;  %2846 = vmatprep.mubr.msk.f32.mxu1 %vm3097_vm1, %v3098_v18 }
 0x32b   :  { %2980 = vmatprep.subr.bf16.mxu1 %v3096_v8 }
 0x3f8   :  { %v1220_v38 = vpop.f32.mrb[24].mxu1  ;;  %v1290_v40 = vpop.f32.mrb[18].mxu0 }
 0x3f9   :  { %v1366_v41 = vadd.f32 %v1365_v39, %v1220_v38  ;;  %v2820_v42 = vpop.f32.mrb[25].mxu1  ;;  %v2827_v43 = vpop.f32.mrb[19].mxu0  ;;  %v1375_v46 = vadd.f32 %v1374_v45, %v1290_v40 }
 0x3fb   :  { %v2569_v44 = vmul.f32 -1.442695, %v1366_v41  ;;  %v2570_v49 = vmul.f32 -1.442695, %v1375_v46  ;;  %v1858_v41 = vld [vmem:[#allocation3 + $0x28] sm:$0xff] }
 0x3fc   :  { %v1360_v47 = vpop.f32.mrb[26].mxu1 }
 0x3fd   :  { %3046 = vpow2.f32 %v2569_v44  ;;  %v2834_v48 = vpop.f32.mrb[27].mxu1  ;;  %v1361_v54 = vadd.f32 %v3276_v29, %v1360_v47 }
 0x3fe   :  { %3048 = vpow2.f32 %v2570_v49 }
 0x407   :  { %v3047_v50 = vpop.eup %3046 }
 0x408   :  { %v1370_v51 = vadd.f32 1.0, %v3047_v50  ;;  %v3049_v52 = vpop.eup %3048 }
 0x409   :  { %v1379_v53 = vadd.f32 1.0, %v3049_v52 }
 0x40a   :  { %3050 = vrcp.f32 %v1370_v51 }
 0x40b   :  { %3052 = vrcp.f32 %v1379_v53  ;;  %v1867_v53 = vld [vmem:[#allocation4 + $0x28] sm:$0xff] }
 0x414   :  { %v3051_v55 = vpop.eup %3050 }
 0x415   :  { %v1384_v56 = vmul.f32 %v3051_v55, %v1361_v54  ;;  %v3053_v59 = vpop.eup %3052 }
 0x416   :  { %v1387_v60 = vsub.f32 1.0, %v3053_v59  ;;  %v1389_v63 = vmul.f32 %v3053_v59, %v1148_v37 }
 0x417   :  { %v1385_v58 = vadd.f32 %v1384_v56, %v1383_v57 }
 0x419   :  { %3054 = vtanh.f32 %v1385_v58 }
 0x423   :  { %v3055_v61 = vpop.eup %3054 }
 0x424   :  { %v1388_v62 = vmul.f32 %v3055_v61, %v1387_v60  ;;  %v2369_v61 = vld [vmem:[%s3449_s4] sm:$0xff] }
 0x426   :  { %v1390_v0 = vadd.f32 %v1389_v63, %v1388_v62 }
 0x428   :  { %1392 = vst.msk [vmem:[#allocation5 + $0x18] sm:$0xff] %vm167_vm2, %v1390_v0  ;;  %2840 = vmatmul.mubr.msk.f32.vlgmr.msra.gmra.mrb[20].mxu0 %vm167_vm2, %v1390_v0  ;;  %2847 = vmatmul.mubr.msk.f32.vlgmr.msra.gmra.mrb[28].mxu1 %vm167_vm2, %v1390_v0 }
 0x429   :  { %2979 = vmatpush3.bf16.msra.mxu0 %v3225_v21  ;;  %2853 = vmatprep.mubr.msk.f32.mxu0 %vm3097_vm1, %v3098_v18 }
 0x42a   :  { %2983 = vmatprep.subr.bf16.mxu0 %v3096_v8  ;;  %2982 = vmatpush3.bf16.msra.mxu1 %v3175_v12 }
 0x42b   :  { %2860 = vmatprep.mubr.msk.f32.mxu1 %vm3097_vm1, %v3098_v18  ;;  %2986 = vmatprep.subr.bf16.mxu1 %v3096_v8 }
 0x42c   :  { %2854 = vmatmul.mubr.msk.f32.vlgmr.msra.gmra.mrb[22].mxu0 %vm167_vm2, %v1390_v0 }
 0x42d   :  { %2985 = vmatpush3.bf16.msra.mxu0 %v3198_v17  ;;  %2867 = vmatprep.mubr.msk.f32.mxu0 %vm3097_vm1, %v3098_v18 }
 0x42e   :  { %2989 = vmatprep.subr.bf16.mxu0 %v3096_v8 }
 0x4fb   :  { %v1462_v1 = vpop.f32.mrb[20].mxu0  ;;  %v1532_v3 = vpop.f32.mrb[28].mxu1 }
 0x4fc   :  { %v1608_v4 = vadd.f32 %v1607_v2, %v1462_v1  ;;  %v2841_v5 = vpop.f32.mrb[21].mxu0  ;;  %v2848_v6 = vpop.f32.mrb[29].mxu1  ;;  %v1617_v10 = vadd.f32 %v1616_v9, %v1532_v3 }
 0x4fe   :  { %v2574_v7 = vmul.f32 -1.442695, %v1608_v4  ;;  %v2575_v14 = vmul.f32 -1.442695, %v1617_v10  ;;  %v2100_v4 = vld [vmem:[#allocation3 + $0x30] sm:$0xff] }
 0x4ff   :  { %v1602_v11 = vpop.f32.mrb[22].mxu0 }
 0x500   :  { %3056 = vpow2.f32 %v2574_v7  ;;  %v2855_v13 = vpop.f32.mrb[23].mxu0  ;;  %v1603_v22 = vadd.f32 %v3276_v29, %v1602_v11 }
 0x501   :  { %3058 = vpow2.f32 %v2575_v14 }
 0x50a   :  { %v3057_v15 = vpop.eup %3056 }
 0x50b   :  { %v1612_v16 = vadd.f32 1.0, %v3057_v15  ;;  %v3059_v19 = vpop.eup %3058 }
 0x50c   :  { %v1621_v20 = vadd.f32 1.0, %v3059_v19 }
 0x50d   :  { %3060 = vrcp.f32 %v1612_v16 }
 0x50e   :  { %3062 = vrcp.f32 %v1621_v20  ;;  %v2109_v20 = vld [vmem:[#allocation4 + $0x30] sm:$0xff] }
 0x517   :  { %v3061_v23 = vpop.eup %3060 }
 0x518   :  { %v1626_v24 = vmul.f32 %v3061_v23, %v1603_v22  ;;  %v3063_v27 = vpop.eup %3062 }
 0x519   :  { %v1629_v28 = vsub.f32 1.0, %v3063_v27  ;;  %v1631_v32 = vmul.f32 %v3063_v27, %v1390_v0  ;;  %v2091_v0 = vld [vmem:[#allocation2 + $0x30] sm:$0xff] }
 0x51a   :  { %v1627_v26 = vadd.f32 %v1626_v24, %v1625_v25 }
 0x51c   :  { %3064 = vtanh.f32 %v1627_v26 }
 0x526   :  { %v3065_v30 = vpop.eup %3064 }
 0x527   :  { %v1630_v31 = vmul.f32 %v3065_v30, %v1629_v28  ;;  %v2361_v30 = vld [vmem:[#allocation5] sm:$0xff] }
 0x529   :  { %v1632_v33 = vadd.f32 %v1631_v32, %v1630_v31  ;;  %v2362_v31 = vld [vmem:[#allocation5 + $0x8] sm:$0xff]  ;;  %v2363_v32 = vld [vmem:[#allocation5 + $0x10] sm:$0xff] }
 0x52b   :  { %1634 = vst.msk [vmem:[#allocation5 + $0x20] sm:$0xff] %vm167_vm2, %v1632_v33  ;;  %2861 = vmatmul.mubr.msk.f32.vlgmr.msra.gmra.mrb[30].mxu1 %vm167_vm2, %v1632_v33  ;;  %2868 = vmatmul.mubr.msk.f32.vlgmr.msra.gmra.mrb[24].mxu0 %vm167_vm2, %v1632_v33 }
 0x52c   :  { %2988 = vmatpush3.bf16.msra.mxu1 %v3225_v21  ;;  %2874 = vmatprep.mubr.msk.f32.mxu1 %vm3097_vm1, %v3098_v18 }
 0x52d   :  { %2992 = vmatprep.subr.bf16.mxu1 %v3096_v8  ;;  %2991 = vmatpush3.bf16.msra.mxu0 %v3175_v12 }
 0x52e   :  { %2881 = vmatprep.mubr.msk.f32.mxu0 %vm3097_vm1, %v3098_v18  ;;  %2995 = vmatprep.subr.bf16.mxu0 %v3096_v8 }
 0x52f   :  { %2875 = vmatmul.mubr.msk.f32.vlgmr.msra.gmra.mrb[32].mxu1 %vm167_vm2, %v1632_v33 }
 0x530   :  { %2994 = vmatpush3.bf16.msra.mxu1 %v3198_v17  ;;  %2888 = vmatprep.mubr.msk.f32.mxu1 %vm3097_vm1, %v3098_v18 }
 0x531   :  { %2998 = vmatprep.subr.bf16.mxu1 %v3096_v8 }
 0x5fe   :  { %v1704_v34 = vpop.f32.mrb[30].mxu1  ;;  %v1774_v36 = vpop.f32.mrb[24].mxu0 }
 0x5ff   :  { %v1850_v37 = vadd.f32 %v1849_v35, %v1704_v34  ;;  %v2862_v38 = vpop.f32.mrb[31].mxu1  ;;  %v2869_v39 = vpop.f32.mrb[25].mxu0  ;;  %v1859_v42 = vadd.f32 %v1858_v41, %v1774_v36  ;;  %v2333_v36 = vld [vmem:[#allocation2 + $0x38] sm:$0xff]  ;;  %v2591_v41 = vld [vmem:[%s3450_s5] ss:$0 sm:$0xff] }
 0x601   :  { %v2579_v40 = vmul.f32 -1.442695, %v1850_v37  ;;  %v2580_v45 = vmul.f32 -1.442695, %v1859_v42 }
 0x602   :  { %v1844_v43 = vpop.f32.mrb[32].mxu1 }
 0x603   :  { %3066 = vpow2.f32 %v2579_v40  ;;  %v2876_v44 = vpop.f32.mrb[33].mxu1  ;;  %v1845_v50 = vadd.f32 %v3276_v29, %v1844_v43  ;;  %v2342_v43 = vld [vmem:[#allocation3 + $0x38] sm:$0xff] }
 0x604   :  { %3068 = vpow2.f32 %v2580_v45 }
 0x60d   :  { %v3067_v46 = vpop.eup %3066 }
 0x60e   :  { %v1854_v47 = vadd.f32 1.0, %v3067_v46  ;;  %v3069_v48 = vpop.eup %3068 }
 0x60f   :  { %v1863_v49 = vadd.f32 1.0, %v3069_v48 }
 0x610   :  { %3070 = vrcp.f32 %v1854_v47 }
 0x611   :  { %3072 = vrcp.f32 %v1863_v49 }
 0x61a   :  { %v3071_v51 = vpop.eup %3070 }
 0x61b   :  { %v1868_v52 = vmul.f32 %v3071_v51, %v1845_v50  ;;  %v3073_v55 = vpop.eup %3072 }
 0x61c   :  { %v1871_v56 = vsub.f32 1.0, %v3073_v55  ;;  %v1873_v59 = vmul.f32 %v3073_v55, %v1632_v33  ;;  %v2364_v33 = vld [vmem:[#allocation5 + $0x18] sm:$0xff] }
 0x61d   :  { %v1869_v54 = vadd.f32 %v1868_v52, %v1867_v53 }
 0x61f   :  { %3074 = vtanh.f32 %v1869_v54 }
 0x629   :  { %v3075_v57 = vpop.eup %3074 }
 0x62a   :  { %v1872_v58 = vmul.f32 %v3075_v57, %v1871_v56 }
 0x62c   :  { %v1874_v60 = vadd.f32 %v1873_v59, %v1872_v58 }
 0x62e   :  { %1876 = vst.msk [vmem:[#allocation5 + $0x28] sm:$0xff] %vm167_vm2, %v1874_v60  ;;  %2882 = vmatmul.mubr.msk.f32.vlgmr.msra.gmra.mrb[26].mxu0 %vm167_vm2, %v1874_v60  ;;  %2889 = vmatmul.mubr.msk.f32.vlgmr.msra.gmra.mrb[34].mxu1 %vm167_vm2, %v1874_v60 }
 0x62f   :  { %2997 = vmatpush3.bf16.msra.mxu0 %v3225_v21  ;;  %2895 = vmatprep.mubr.msk.f32.mxu0 %vm3097_vm1, %v3098_v18 }
 0x630   :  { %3001 = vmatprep.subr.bf16.mxu0 %v3096_v8  ;;  %3000 = vmatpush3.bf16.msra.mxu1 %v3175_v12  ;;  %v2370_v12 = vld [vmem:[%s3449_s4 + $0x8] sm:$0xff] }
 0x631   :  { %2902 = vmatprep.mubr.msk.f32.mxu1 %vm3097_vm1, %v3098_v18  ;;  %3004 = vmatprep.subr.bf16.mxu1 %v3096_v8  ;;  %v3007_v62 = vpack.c.bf16 %v2370_v12, %v2369_v61 }
 0x632   :  { %2896 = vmatmul.mubr.msk.f32.vlgmr.msra.gmra.mrb[28].mxu0 %vm167_vm2, %v1874_v60 }
 0x633   :  { %3003 = vmatpush3.bf16.msra.mxu0 %v3198_v17  ;;  %2909 = vmatprep.mubr.msk.f32.mxu0 %vm3097_vm1, %v3098_v18 }
 0x634   :  { %3008 = vmatprep.subr.bf16.mxu0 %v3007_v62 }
 0x635   :  { %v2366_v34 = vld [vmem:[#allocation5 + $0x28] sm:$0xff] }
 0x701   :  { %v1946_v63 = vpop.f32.mrb[26].mxu0  ;;  %v2016_v8 = vpop.f32.mrb[34].mxu1 }
 0x702   :  { %v2092_v1 = vadd.f32 %v2091_v0, %v1946_v63  ;;  %v2883_v2 = vpop.f32.mrb[27].mxu0  ;;  %v2890_v3 = vpop.f32.mrb[35].mxu1  ;;  %v2101_v5 = vadd.f32 %v2100_v4, %v2016_v8 }
 0x704   :  { %v2584_v17 = vmul.f32 -1.442695, %v2092_v1  ;;  %v2585_v9 = vmul.f32 -1.442695, %v2101_v5  ;;  %v2351_v1 = vld [vmem:[#allocation4 + $0x38] sm:$0xff] }
 0x705   :  { %v2086_v6 = vpop.f32.mrb[28].mxu0 }
 0x706   :  { %3076 = vpow2.f32 %v2584_v17  ;;  %v2897_v7 = vpop.f32.mrb[29].mxu0  ;;  %v2087_v15 = vadd.f32 %v3276_v29, %v2086_v6 }
 0x707   :  { %3078 = vpow2.f32 %v2585_v9 }
 0x710   :  { %v3077_v10 = vpop.eup %3076 }
 0x711   :  { %v2096_v11 = vadd.f32 1.0, %v3077_v10  ;;  %v3079_v13 = vpop.eup %3078 }
 0x712   :  { %v2105_v14 = vadd.f32 1.0, %v3079_v13 }
 0x713   :  { %3080 = vrcp.f32 %v2096_v11 }
 0x714   :  { %3082 = vrcp.f32 %v2105_v14 }
 0x71d   :  { %v3081_v16 = vpop.eup %3080 }
 0x71e   :  { %v2110_v19 = vmul.f32 %v3081_v16, %v2087_v15  ;;  %v3083_v23 = vpop.eup %3082 }
 0x71f   :  { %v2113_v24 = vsub.f32 1.0, %v3083_v23  ;;  %v2115_v27 = vmul.f32 %v3083_v23, %v1874_v60 }
 0x720   :  { %v2111_v22 = vadd.f32 %v2110_v19, %v2109_v20 }
 0x722   :  { %3084 = vtanh.f32 %v2111_v22 }
 0x72c   :  { %v3085_v25 = vpop.eup %3084 }
 0x72d   :  { %v2114_v26 = vmul.f32 %v3085_v25, %v2113_v24 }
 0x72f   :  { %v3386_v28 = vadd.f32 %v2115_v27, %v2114_v26 }
 0x731   :  { %2118 = vst.msk [vmem:[#allocation5 + $0x30] sm:$0xff] %vm167_vm2, %v3386_v28  ;;  %2903 = vmatmul.mubr.msk.f32.vlgmr.msra.gmra.mrb[36].mxu1 %vm167_vm2, %v3386_v28  ;;  %2910 = vmatmul.mubr.msk.f32.vlgmr.msra.gmra.mrb[30].mxu0 %vm167_vm2, %v3386_v28 }
 0x732   :  { %3006 = vmatpush3.bf16.msra.mxu1 %v3225_v21  ;;  %3010 = vmatpush3.bf16.msra.mxu0 %v3007_v62  ;;  %v2365_v21 = vld [vmem:[#allocation5 + $0x20] sm:$0xff] }
 0x733   :  { %2923 = vmatprep.mubr.msk.f32.mxu0 %vm167_vm2, %v2361_v30  ;;  %2916 = vmatprep.mubr.msk.f32.mxu1 %vm3097_vm1, %v3098_v18 }
 0x735   :  { %2917 = vmatmul.mubr.msk.f32.vlgmr.msra.gmra.mrb[38].mxu1 %vm167_vm2, %v3386_v28  ;;  %2924 = vmatmul.mubr.msk.f32.vlgmr.msra.gmra.mrb[32].mxu0 %vm167_vm2, %v2362_v31 }
 0x736   :  { %2926 = vmatprep.mubr.msk.f32.mxu0 %vm167_vm2, %v2363_v32 }
 0x738   :  { %v2367_v35 = vld [vmem:[#allocation5 + $0x30] sm:$0xff] }
 0x739   :  { %2927 = vmatmul.mubr.msk.f32.gmra.mrb[34].mxu0 %vm167_vm2, %v2364_v33 }
 0x73a   :  { %2929 = vmatprep.mubr.msk.f32.mxu0 %vm167_vm2, %v2365_v21 }
 0x73d   :  { %2930 = vmatmul.mubr.msk.f32.gmra.mrb[36].mxu0 %vm167_vm2, %v2366_v34 }
 0x73e   :  { %2932 = vmatprep.mubr.msk.f32.mxu0 %vm167_vm2, %v2367_v35 }
 0x804   :  { %v2188_v18 = vpop.f32.mrb[36].mxu1  ;;  %v2258_v37 = vpop.f32.mrb[30].mxu0 }
 0x805   :  { %v2334_v38 = vadd.f32 %v2333_v36, %v2188_v18  ;;  %v2904_v39 = vpop.f32.mrb[37].mxu1  ;;  %v2911_v40 = vpop.f32.mrb[31].mxu0  ;;  %v2343_v44 = vadd.f32 %v2342_v43, %v2258_v37 }
 0x807   :  { %v2589_v42 = vmul.f32 -1.442695, %v2334_v38  ;;  %v2590_v51 = vmul.f32 -1.442695, %v2343_v44 }
 0x808   :  { %v2328_v45 = vpop.f32.mrb[38].mxu1  ;;  %v2925_v46 = vpop.f32.mrb[32].mxu0 }
 0x809   :  { %3086 = vpow2.f32 %v2589_v42  ;;  %v2474_v47 = vadd.f32 %v2925_v46, %v2591_v41  ;;  %v2918_v48 = vpop.f32.mrb[39].mxu1  ;;  %v2468_v49 = vpop.f32.mrb[33].mxu0  ;;  %v2329_v63 = vadd.f32 %v3276_v29, %v2328_v45 }
 0x80a   :  { %v2469_v50 = vadd.f32 %v2591_v41, %v2468_v49  ;;  %3088 = vpow2.f32 %v2590_v51 }
 0x80b   :  { %2509 = vst.msk [vmem:[%s3451_s6 + $0x8] sm:$0xff] %vm2507_vm3, %v2474_v47 }
 0x80c   :  { %2508 = vst.msk [vmem:[%s3451_s6] sm:$0xff] %vm2507_vm3, %v2469_v50  ;;  %v2928_v52 = vpop.f32.mrb[34].mxu0 }
 0x80d   :  { %v2484_v53 = vadd.f32 %v2928_v52, %v2591_v41  ;;  %v2478_v54 = vpop.f32.mrb[35].mxu0 }
 0x80e   :  { %v2479_v55 = vadd.f32 %v2591_v41, %v2478_v54 }
 0x80f   :  { %2511 = vst.msk [vmem:[%s3451_s6 + $0x18] sm:$0xff] %vm2507_vm3, %v2484_v53 }
 0x810   :  { %2510 = vst.msk [vmem:[%s3451_s6 + $0x10] sm:$0xff] %vm2507_vm3, %v2479_v55  ;;  %v2931_v56 = vpop.f32.mrb[36].mxu0 }
 0x811   :  { %v2494_v57 = vadd.f32 %v2931_v56, %v2591_v41  ;;  %v2488_v58 = vpop.f32.mrb[37].mxu0 }
 0x812   :  { %v2489_v59 = vadd.f32 %v2591_v41, %v2488_v58 }
 0x813   :  { %v3087_v60 = vpop.eup %3086  ;;  %2513 = vst.msk [vmem:[%s3451_s6 + $0x28] sm:$0xff] %vm2507_vm3, %v2494_v57 }
 0x814   :  { %v2338_v61 = vadd.f32 1.0, %v3087_v60  ;;  %2512 = vst.msk [vmem:[%s3451_s6 + $0x20] sm:$0xff] %vm2507_vm3, %v2489_v59  ;;  %v3089_v12 = vpop.eup %3088 }
 0x815   :  { %v2347_v62 = vadd.f32 1.0, %v3089_v12 }
 0x816   :  { %3090 = vrcp.f32 %v2338_v61 }
 0x817   :  { %3092 = vrcp.f32 %v2347_v62 }
 0x820   :  { %v3091_v0 = vpop.eup %3090 }
 0x821   :  { %v2352_v8 = vmul.f32 %v3091_v0, %v2329_v63  ;;  %v3093_v3 = vpop.eup %3092 }
 0x822   :  { %v2355_v17 = vsub.f32 1.0, %v3093_v3  ;;  %v2357_v5 = vmul.f32 %v3093_v3, %v3386_v28 }
 0x823   :  { %v2353_v2 = vadd.f32 %v2352_v8, %v2351_v1 }
 0x825   :  { %3094 = vtanh.f32 %v2353_v2 }
 0x82f   :  { %v3095_v4 = vpop.eup %3094 }
 0x830   :  { %v2356_v6 = vmul.f32 %v3095_v4, %v2355_v17 }
 0x832   :  { %v2358_v7 = vadd.f32 %v2357_v5, %v2356_v6 }
 0x834   :  { %2360 = vst.msk [vmem:[#allocation5 + $0x38] sm:$0xff] %vm167_vm2, %v2358_v7 }
 0x83b   :  { %v2368_v9 = vld [vmem:[#allocation5 + $0x38] sm:$0xff] }
 0x83c   :  { %2933 = vmatmul.mubr.msk.f32.gmra.mrb[38].mxu0 %vm167_vm2, %v2368_v9 }
 0x90f   :  { %v2934_v10 = vpop.f32.mrb[38].mxu0 }
 0x910   :  { %v2504_v29 = vadd.f32 %v2934_v10, %v2591_v41  ;;  %v2498_v11 = vpop.f32.mrb[39].mxu0 }
 0x911   :  { %v2499_v13 = vadd.f32 %v2591_v41, %v2498_v11 }
 0x912   :  { %2515 = vst.msk [vmem:[%s3451_s6 + $0x38] sm:$0xff] %vm2507_vm3, %v2504_v29 }
 0x913   :  { %2514 = vst.msk [vmem:[%s3451_s6 + $0x30] sm:$0xff] %vm2507_vm3, %v2499_v13 }

</bundles_post_ra>
